<compile_context>
chip_gen: v7x
topology: tpu7x:2x2x1
jax: 0.10.0
libtpu: 0.0.40
codegen_flags: <defaults>
</compile_context>

<pallas_src>
import functools
import math

import jax
import jax.numpy as jnp
from jax.experimental import pallas as pl
from jax.experimental.pallas import tpu as pltpu

LN_EPS = 1e-5


# -----------------------------------------------------------------------------
# Fused TransformerEncoderLayer kernel (post-norm, batch_first, gelu, eval).
# One grid step = one batch element; all layer weights are VMEM-resident.
# -----------------------------------------------------------------------------
def _ln(x, g, b):
    """Row LayerNorm in f32; g/b are (1, D)."""
    m = jnp.mean(x, axis=-1, keepdims=True)
    v = jnp.mean((x - m) ** 2, axis=-1, keepdims=True)
    return (x - m) * jax.lax.rsqrt(v + LN_EPS) * g.astype(jnp.float32) \
        + b.astype(jnp.float32)


def _make_encoder_layer_kernel(nhead, scale):
    def kernel(x_ref, wqkv_ref, bqkv_ref, wo_ref, bo_ref,
               g1_ref, bt1_ref, wf1_ref, bf1_ref, wf2_ref, bf2_ref,
               g2_ref, bt2_ref, o_ref):
        x = x_ref[0].astype(jnp.float32)                     # (S, D)
        d = x.shape[-1]
        dh = d // nhead

        # ---- self-attention (bf16 MXU operands, f32 accumulation) ----------
        qkv = jnp.dot(x.astype(jnp.bfloat16), wqkv_ref[...],
                      preferred_element_type=jnp.float32)
        qkv = qkv + bqkv_ref[...].astype(jnp.float32)        # (S, 3D)

        heads = []
        for h in range(nhead):                               # static loop
            q = qkv[:, h * dh:(h + 1) * dh].astype(jnp.bfloat16)
            k = qkv[:, d + h * dh:d + (h + 1) * dh].astype(jnp.bfloat16)
            v = qkv[:, 2 * d + h * dh:2 * d + (h + 1) * dh].astype(jnp.bfloat16)
            s = jax.lax.dot_general(q, k, (((1,), (1,)), ((), ())),
                                    preferred_element_type=jnp.float32) * scale
            s = s - jnp.max(s, axis=-1, keepdims=True)
            p = jnp.exp(s)
            den = jnp.sum(p, axis=-1, keepdims=True)
            inv = pl.reciprocal(den, approx=True)            # EUP slot
            inv = inv * (2.0 - den * inv)                    # one Newton step
            p = p * inv
            heads.append(jnp.dot(p.astype(jnp.bfloat16), v,
                                 preferred_element_type=jnp.float32))
        attn = jnp.concatenate(heads, axis=-1)               # (S, D) f32
        attn = jnp.dot(attn.astype(jnp.bfloat16), wo_ref[...],
                       preferred_element_type=jnp.float32)
        attn = attn + bo_ref[...].astype(jnp.float32)

        h1 = _ln(x + attn, g1_ref[...], bt1_ref[...])        # norm1(x + sa)

        # ---- feed-forward ---------------------------------------------------
        ff = jnp.dot(h1.astype(jnp.bfloat16), wf1_ref[...],
                     preferred_element_type=jnp.float32)
        ff = jax.nn.gelu(ff + bf1_ref[...].astype(jnp.float32), approximate=True)
        ff = jnp.dot(ff.astype(jnp.bfloat16), wf2_ref[...],
                     preferred_element_type=jnp.float32)
        ff = ff + bf2_ref[...].astype(jnp.float32)

        o_ref[0] = _ln(h1 + ff, g2_ref[...], bt2_ref[...]).astype(o_ref.dtype)

    return kernel


def encoder_layer(x, p, nhead):
    """One fused pallas_call per encoder layer.  x: (B, S+1, D) f32."""
    B, S1, D = x.shape
    Dh = D // nhead
    Ff = p["ff1_w"].shape[1]
    scale = 1.0 / math.sqrt(Dh)
    bf16 = jnp.bfloat16

    weights = [
        p["in_proj_w"].astype(bf16), p["in_proj_b"].reshape(1, -1),
        p["out_proj_w"].astype(bf16), p["out_proj_b"].reshape(1, -1),
        p["ln1_g"].reshape(1, -1), p["ln1_b"].reshape(1, -1),
        p["ff1_w"].astype(bf16), p["ff1_b"].reshape(1, -1),
        p["ff2_w"].astype(bf16), p["ff2_b"].reshape(1, -1),
        p["ln2_g"].reshape(1, -1), p["ln2_b"].reshape(1, -1),
    ]
    w_specs = [pl.BlockSpec(w.shape, lambda b: (0, 0)) for w in weights]

    # VMEM budget from actual resident blocks: double-buffered weights + the
    # (1, S+1, D) in/out blocks, plus slack for in-kernel temporaries
    # (qkv, (S, 2048) FF intermediate) and compiler scratch.
    w_bytes = sum(int(w.size) * w.dtype.itemsize for w in weights)
    io_bytes = 2 * S1 * D * x.dtype.itemsize
    vmem_limit = 2 * (w_bytes + io_bytes) + (8 << 20)

    flops = (2 * B * S1 * D * (3 * D)          # qkv projection
             + 4 * B * nhead * S1 * S1 * Dh    # qk^T and pv
             + 2 * B * S1 * D * D              # output projection
             + 4 * B * S1 * D * Ff)            # ff1 + ff2
    transcendentals = B * nhead * S1 * S1 + B * S1 * Ff + 2 * B * S1
    bytes_accessed = 2 * B * S1 * D * x.dtype.itemsize + w_bytes

    return pl.pallas_call(
        _make_encoder_layer_kernel(nhead, scale),
        out_shape=jax.ShapeDtypeStruct((B, S1, D), x.dtype),
        grid=(B,),
        in_specs=[pl.BlockSpec((1, S1, D), lambda b: (b, 0, 0))] + w_specs,
        out_specs=pl.BlockSpec((1, S1, D), lambda b: (b, 0, 0)),
        compiler_params=pltpu.CompilerParams(
            dimension_semantics=("parallel",),
            vmem_limit_bytes=vmem_limit),
        cost_estimate=pl.CostEstimate(
            flops=flops, transcendentals=transcendentals,
            bytes_accessed=bytes_accessed),
    )(x, *weights)


# -----------------------------------------------------------------------------
# Plain-JAX glue (tiny, launch-overhead-dominated as standalone kernels):
# NeRF featurization, latent/emb projections, PE add, pred_head.
# -----------------------------------------------------------------------------
def nerf_pos_embedding(x, n_freq):
    outs = [x]
    for k in range(n_freq):
        f = float(2 ** k)
        outs.append(jnp.sin(f * x))
        outs.append(jnp.cos(f * x))
    return jnp.concatenate(outs, axis=-1)


def sinusoidal_pe_table(length, d_model, dtype=jnp.float32):
    pos = jnp.arange(length, dtype=jnp.float32)[:, None]
    div = jnp.exp(jnp.arange(0, d_model, 2, dtype=jnp.float32)
                  * (-math.log(10000.0) / d_model))
    pe = jnp.zeros((length, d_model), jnp.float32)
    pe = pe.at[:, 0::2].set(jnp.sin(pos * div))
    pe = pe.at[:, 1::2].set(jnp.cos(pos * div))
    return pe.astype(dtype)


def input_embedding(params, noisy, emb, env_emb, n_freq, env_emb_dim):
    """latent_embed + env concat + proj(emb) token + positional encoding."""
    feat = nerf_pos_embedding(noisy, n_freq)
    lat = jnp.dot(feat, params["latent_w"]) + params["latent_b"]
    if env_emb_dim > 0:
        lat = jnp.concatenate([lat, env_emb], axis=-1)
    tok0 = jnp.dot(emb, params["proj_w"]) + params["proj_b"]
    xseq = jnp.concatenate([tok0[:, None, :], lat], axis=1)     # (B, S+1, D)
    pe = sinusoidal_pe_table(xseq.shape[1], xseq.shape[2], xseq.dtype)
    return xseq + pe[None]                                      # dropout == id


def pred_head(params, x, B, S):
    x = x[:, -S:]
    D = x.shape[-1]
    delta = jnp.dot(x.reshape(-1, D), params["head_w"]) + params["head_b"]
    return delta.reshape(B, -1)


# -----------------------------------------------------------------------------
# Full TransformerPredictor.forward (Pallas path).
# -----------------------------------------------------------------------------
def transformer_predictor_forward(params, noisy, emb, env_emb, *,
                                  n_freq, nhead, env_emb_dim):
    B, S, _ = noisy.shape
    x = input_embedding(params, noisy, emb, env_emb, n_freq, env_emb_dim)
    for lp in params["layers"]:
        x = encoder_layer(x, lp, nhead)
    return pred_head(params, x, B, S)


# -----------------------------------------------------------------------------
# Pure-JAX reference (mirrors the kernel's bf16 matmul-operand rounding so
# the check isolates true kernel errors; all non-matmul math stays f32).
# -----------------------------------------------------------------------------
def _mm_bf16(a, w):
    return jnp.dot(a.astype(jnp.bfloat16), w.astype(jnp.bfloat16),
                   preferred_element_type=jnp.float32)


def _ref_layernorm(x, g, b):
    m = jnp.mean(x, axis=-1, keepdims=True)
    v = jnp.mean((x - m) ** 2, axis=-1, keepdims=True)
    return (x - m) * jax.lax.rsqrt(v + LN_EPS) * g + b


def _ref_encoder_layer(x, p, nhead):
    B, S1, D = x.shape
    Dh = D // nhead
    qkv = _mm_bf16(x, p["in_proj_w"]) + p["in_proj_b"]
    q, k, v = jnp.split(qkv, 3, axis=-1)

    def split_heads(t):
        return t.reshape(B, S1, nhead, Dh).transpose(0, 2, 1, 3)

    q, k, v = split_heads(q), split_heads(k), split_heads(v)
    s = jnp.einsum("bhqd,bhkd->bhqk",
                   q.astype(jnp.bfloat16), k.astype(jnp.bfloat16),
                   preferred_element_type=jnp.float32) * (1.0 / math.sqrt(Dh))
    a = jax.nn.softmax(s, axis=-1)
    o = jnp.einsum("bhqk,bhkd->bhqd",
                   a.astype(jnp.bfloat16), v.astype(jnp.bfloat16),
                   preferred_element_type=jnp.float32)
    o = o.transpose(0, 2, 1, 3).reshape(B, S1, D)
    o = _mm_bf16(o, p["out_proj_w"]) + p["out_proj_b"]
    x = _ref_layernorm(x + o, p["ln1_g"], p["ln1_b"])
    h = jax.nn.gelu(_mm_bf16(x, p["ff1_w"]) + p["ff1_b"], approximate=True)
    h = _mm_bf16(h, p["ff2_w"]) + p["ff2_b"]
    return _ref_layernorm(x + h, p["ln2_g"], p["ln2_b"])


def reference_forward(params, noisy, emb, env_emb, *, n_freq, nhead, env_emb_dim):
    B, S, _ = noisy.shape
    x = input_embedding(params, noisy, emb, env_emb, n_freq, env_emb_dim)
    for lp in params["layers"]:
        x = _ref_encoder_layer(x, lp, nhead)
    return pred_head(params, x, B, S)


if __name__ == "__main__":
    # Small config consistent with the module.
    B = 2
    seqlen = 8
    state_size, kp_size = 4, 1
    n_freq = 8
    in_channels, condition_dim = 20, 4            # emb dim = 16
    env_emb_dim = 32
    hidden_size = 128                             # lane-dense feature dim
    hidden_layers = 2
    nhead = 4
    dim_ff = 2048                                 # TransformerEncoderLayer default

    sk = state_size * kp_size
    pe_feat_dim = sk * (2 * n_freq + 1)
    lat_out = hidden_size - env_emb_dim

    keys = iter(jax.random.split(jax.random.PRNGKey(0), 64))

    def w_init(shape, fan_in):
        return jax.random.normal(next(keys), shape, jnp.float32) / math.sqrt(fan_in)

    def b_init(shape):
        return 0.1 * jax.random.normal(next(keys), shape, jnp.float32)

    layers = []
    for _ in range(hidden_layers):
        layers.append(dict(
            in_proj_w=w_init((hidden_size, 3 * hidden_size), hidden_size),
            in_proj_b=b_init((3 * hidden_size,)),
            out_proj_w=w_init((hidden_size, hidden_size), hidden_size),
            out_proj_b=b_init((hidden_size,)),
            ln1_g=jnp.ones((hidden_size,), jnp.float32),
            ln1_b=jnp.zeros((hidden_size,), jnp.float32),
            ff1_w=w_init((hidden_size, dim_ff), hidden_size),
            ff1_b=b_init((dim_ff,)),
            ff2_w=w_init((dim_ff, hidden_size), dim_ff),
            ff2_b=b_init((hidden_size,)),
            ln2_g=jnp.ones((hidden_size,), jnp.float32),
            ln2_b=jnp.zeros((hidden_size,), jnp.float32),
        ))

    params = dict(
        latent_w=w_init((pe_feat_dim, lat_out), pe_feat_dim),
        latent_b=b_init((lat_out,)),
        proj_w=w_init((in_channels - condition_dim, hidden_size),
                      in_channels - condition_dim),
        proj_b=b_init((hidden_size,)),
        layers=layers,
        # NOTE: the PyTorch module zero-inits pred_head (delta == 0 at init);
        # random weights are used here so the numerical check is non-trivial.
        head_w=w_init((hidden_size, sk), hidden_size),
        head_b=b_init((sk,)),
    )

    noisy = jax.random.normal(next(keys), (B, seqlen, sk), jnp.float32)
    emb = jax.random.normal(next(keys), (B, in_channels - condition_dim), jnp.float32)
    env_emb = jax.random.normal(next(keys), (B, seqlen, env_emb_dim), jnp.float32)

    fwd = jax.jit(functools.partial(
        transformer_predictor_forward,
        n_freq=n_freq, nhead=nhead, env_emb_dim=env_emb_dim))

    delta = jax.block_until_ready(fwd(params, noisy, emb, env_emb))
    assert delta.shape == (B, seqlen * sk)

    ref = jax.block_until_ready(reference_forward(
        params, noisy, emb, env_emb,
        n_freq=n_freq, nhead=nhead, env_emb_dim=env_emb_dim))

    # bf16 MXU rounding is mirrored in the reference; the tolerance covers the
    # approximate-reciprocal softmax (Newton-refined), transcendental lowering
    # differences and accumulation-order effects (values are O(1)).
    assert jnp.allclose(delta, ref, atol=5e-3, rtol=5e-3), \
        float(jnp.max(jnp.abs(delta - ref)))

    print("KERNEL_OK")
</pallas_src>

<mosaic_0001>
module attributes {stable_mosaic.version = 11 : i64} {
  func.func @kernel(%arg0: i32, %arg1: memref<1x9x128xf32, #tpu.memory_space<vmem>>, %arg2: memref<128x384xbf16, #tpu.memory_space<vmem>>, %arg3: memref<1x384xf32, #tpu.memory_space<vmem>>, %arg4: memref<128x128xbf16, #tpu.memory_space<vmem>>, %arg5: memref<1x128xf32, #tpu.memory_space<vmem>>, %arg6: memref<1x128xf32, #tpu.memory_space<vmem>>, %arg7: memref<1x128xf32, #tpu.memory_space<vmem>>, %arg8: memref<128x2048xbf16, #tpu.memory_space<vmem>>, %arg9: memref<1x2048xf32, #tpu.memory_space<vmem>>, %arg10: memref<2048x128xbf16, #tpu.memory_space<vmem>>, %arg11: memref<1x128xf32, #tpu.memory_space<vmem>>, %arg12: memref<1x128xf32, #tpu.memory_space<vmem>>, %arg13: memref<1x128xf32, #tpu.memory_space<vmem>>, %arg14: memref<1x9x128xf32, #tpu.memory_space<vmem>>) attributes {dimension_semantics = [#tpu.dimension_semantics<parallel>], iteration_bounds = array<i64: 2>, scalar_prefetch = 0 : i64, scratch_operands = 0 : i64, tpu.core_type = #tpu.core_type<tc>, window_params = [{transform_indices = @transform_0, window_bounds = array<i64: 1, 9, 128>}, {pipeline_mode = #tpu.pipeline_mode<synchronous>, transform_indices = @transform_1, window_bounds = array<i64: 128, 384>}, {pipeline_mode = #tpu.pipeline_mode<synchronous>, transform_indices = @transform_2, window_bounds = array<i64: 1, 384>}, {pipeline_mode = #tpu.pipeline_mode<synchronous>, transform_indices = @transform_3, window_bounds = array<i64: 128, 128>}, {pipeline_mode = #tpu.pipeline_mode<synchronous>, transform_indices = @transform_4, window_bounds = array<i64: 1, 128>}, {pipeline_mode = #tpu.pipeline_mode<synchronous>, transform_indices = @transform_5, window_bounds = array<i64: 1, 128>}, {pipeline_mode = #tpu.pipeline_mode<synchronous>, transform_indices = @transform_6, window_bounds = array<i64: 1, 128>}, {pipeline_mode = #tpu.pipeline_mode<synchronous>, transform_indices = @transform_7, window_bounds = array<i64: 128, 2048>}, {pipeline_mode = #tpu.pipeline_mode<synchronous>, transform_indices = @transform_8, window_bounds = array<i64: 1, 2048>}, {pipeline_mode = #tpu.pipeline_mode<synchronous>, transform_indices = @transform_9, window_bounds = array<i64: 2048, 128>}, {pipeline_mode = #tpu.pipeline_mode<synchronous>, transform_indices = @transform_10, window_bounds = array<i64: 1, 128>}, {pipeline_mode = #tpu.pipeline_mode<synchronous>, transform_indices = @transform_11, window_bounds = array<i64: 1, 128>}, {pipeline_mode = #tpu.pipeline_mode<synchronous>, transform_indices = @transform_12, window_bounds = array<i64: 1, 128>}, {transform_indices = @transform_13, window_bounds = array<i64: 1, 9, 128>}]} {
    %c0 = arith.constant 0 : index
    %c0_0 = arith.constant 0 : index
    %c0_1 = arith.constant 0 : index
    %0 = vector.load %arg1[%c0, %c0_0, %c0_1] : memref<1x9x128xf32, #tpu.memory_space<vmem>>, vector<1x9x128xf32>
    %1 = vector.shape_cast %0 : vector<1x9x128xf32> to vector<9x128xf32>
    %2 = arith.truncf %1 : vector<9x128xf32> to vector<9x128xbf16>
    %c0_2 = arith.constant 0 : index
    %c0_3 = arith.constant 0 : index
    %3 = vector.load %arg2[%c0_2, %c0_3] : memref<128x384xbf16, #tpu.memory_space<vmem>>, vector<128x384xbf16>
    %cst = arith.constant dense<0.000000e+00> : vector<9x384xf32>
    %4 = tpu.matmul %2, %3, %cst {dimension_numbers = #tpu.dot_dimension_numbers<[1], [0], [0], [1], [0, 0, 1, 1], [], []>} : vector<9x128xbf16>, vector<128x384xbf16>, vector<9x384xf32> -> vector<9x384xf32>
    %c0_4 = arith.constant 0 : index
    %c0_5 = arith.constant 0 : index
    %5 = vector.load %arg3[%c0_4, %c0_5] : memref<1x384xf32, #tpu.memory_space<vmem>>, vector<1x384xf32>
    %6 = vector.broadcast %5 : vector<1x384xf32> to vector<9x384xf32>
    %7 = arith.addf %4, %6 : vector<9x384xf32>
    %8 = vector.extract_strided_slice %7 {offsets = [0, 0], sizes = [9, 32], strides = [1, 1]} : vector<9x384xf32> to vector<9x32xf32>
    %9 = arith.truncf %8 : vector<9x32xf32> to vector<9x32xbf16>
    %10 = vector.extract_strided_slice %7 {offsets = [0, 128], sizes = [9, 32], strides = [1, 1]} : vector<9x384xf32> to vector<9x32xf32>
    %11 = arith.truncf %10 : vector<9x32xf32> to vector<9x32xbf16>
    %12 = vector.extract_strided_slice %7 {offsets = [0, 256], sizes = [9, 32], strides = [1, 1]} : vector<9x384xf32> to vector<9x32xf32>
    %13 = arith.truncf %12 : vector<9x32xf32> to vector<9x32xbf16>
    %cst_6 = arith.constant dense<0.000000e+00> : vector<9x9xf32>
    %14 = tpu.matmul %9, %11, %cst_6 {dimension_numbers = #tpu.dot_dimension_numbers<[1], [1], [0], [0], [0, 0, 1, 0], [], []>} : vector<9x32xbf16>, vector<9x32xbf16>, vector<9x9xf32> -> vector<9x9xf32>
    %cst_7 = arith.constant 0.176776692 : f32
    %15 = vector.broadcast %cst_7 : f32 to vector<9x9xf32>
    %16 = arith.mulf %14, %15 : vector<9x9xf32>
    %cst_8 = arith.constant dense<0xFF800000> : vector<9xf32>
    %17 = vector.multi_reduction <maximumf>, %16, %cst_8 [1] : vector<9x9xf32> to vector<9xf32>
    %18 = vector.shape_cast %17 : vector<9xf32> to vector<9x1xf32>
    %19 = vector.broadcast %18 : vector<9x1xf32> to vector<9x9xf32>
    %20 = arith.subf %16, %19 : vector<9x9xf32>
    %21 = math.exp %20 : vector<9x9xf32>
    %cst_9 = arith.constant dense<0.000000e+00> : vector<9xf32>
    %22 = vector.multi_reduction <add>, %21, %cst_9 [1] : vector<9x9xf32> to vector<9xf32>
    %23 = vector.shape_cast %22 : vector<9xf32> to vector<9x1xf32>
    %24 = tpu.reciprocal %23 {approx = true} : vector<9x1xf32> -> vector<9x1xf32>
    %25 = arith.mulf %23, %24 : vector<9x1xf32>
    %cst_10 = arith.constant 2.000000e+00 : f32
    %26 = vector.broadcast %cst_10 : f32 to vector<9x1xf32>
    %27 = arith.subf %26, %25 : vector<9x1xf32>
    %28 = arith.mulf %24, %27 : vector<9x1xf32>
    %29 = vector.broadcast %28 : vector<9x1xf32> to vector<9x9xf32>
    %30 = arith.mulf %21, %29 : vector<9x9xf32>
    %31 = arith.truncf %30 : vector<9x9xf32> to vector<9x9xbf16>
    %cst_11 = arith.constant dense<0.000000e+00> : vector<9x32xf32>
    %32 = tpu.matmul %31, %13, %cst_11 {dimension_numbers = #tpu.dot_dimension_numbers<[1], [0], [0], [1], [0, 0, 1, 1], [], []>} : vector<9x9xbf16>, vector<9x32xbf16>, vector<9x32xf32> -> vector<9x32xf32>
    %33 = vector.extract_strided_slice %7 {offsets = [0, 32], sizes = [9, 32], strides = [1, 1]} : vector<9x384xf32> to vector<9x32xf32>
    %34 = arith.truncf %33 : vector<9x32xf32> to vector<9x32xbf16>
    %35 = vector.extract_strided_slice %7 {offsets = [0, 160], sizes = [9, 32], strides = [1, 1]} : vector<9x384xf32> to vector<9x32xf32>
    %36 = arith.truncf %35 : vector<9x32xf32> to vector<9x32xbf16>
    %37 = vector.extract_strided_slice %7 {offsets = [0, 288], sizes = [9, 32], strides = [1, 1]} : vector<9x384xf32> to vector<9x32xf32>
    %38 = arith.truncf %37 : vector<9x32xf32> to vector<9x32xbf16>
    %cst_12 = arith.constant dense<0.000000e+00> : vector<9x9xf32>
    %39 = tpu.matmul %34, %36, %cst_12 {dimension_numbers = #tpu.dot_dimension_numbers<[1], [1], [0], [0], [0, 0, 1, 0], [], []>} : vector<9x32xbf16>, vector<9x32xbf16>, vector<9x9xf32> -> vector<9x9xf32>
    %cst_13 = arith.constant 0.176776692 : f32
    %40 = vector.broadcast %cst_13 : f32 to vector<9x9xf32>
    %41 = arith.mulf %39, %40 : vector<9x9xf32>
    %cst_14 = arith.constant dense<0xFF800000> : vector<9xf32>
    %42 = vector.multi_reduction <maximumf>, %41, %cst_14 [1] : vector<9x9xf32> to vector<9xf32>
    %43 = vector.shape_cast %42 : vector<9xf32> to vector<9x1xf32>
    %44 = vector.broadcast %43 : vector<9x1xf32> to vector<9x9xf32>
    %45 = arith.subf %41, %44 : vector<9x9xf32>
    %46 = math.exp %45 : vector<9x9xf32>
    %cst_15 = arith.constant dense<0.000000e+00> : vector<9xf32>
    %47 = vector.multi_reduction <add>, %46, %cst_15 [1] : vector<9x9xf32> to vector<9xf32>
    %48 = vector.shape_cast %47 : vector<9xf32> to vector<9x1xf32>
    %49 = tpu.reciprocal %48 {approx = true} : vector<9x1xf32> -> vector<9x1xf32>
    %50 = arith.mulf %48, %49 : vector<9x1xf32>
    %cst_16 = arith.constant 2.000000e+00 : f32
    %51 = vector.broadcast %cst_16 : f32 to vector<9x1xf32>
    %52 = arith.subf %51, %50 : vector<9x1xf32>
    %53 = arith.mulf %49, %52 : vector<9x1xf32>
    %54 = vector.broadcast %53 : vector<9x1xf32> to vector<9x9xf32>
    %55 = arith.mulf %46, %54 : vector<9x9xf32>
    %56 = arith.truncf %55 : vector<9x9xf32> to vector<9x9xbf16>
    %cst_17 = arith.constant dense<0.000000e+00> : vector<9x32xf32>
    %57 = tpu.matmul %56, %38, %cst_17 {dimension_numbers = #tpu.dot_dimension_numbers<[1], [0], [0], [1], [0, 0, 1, 1], [], []>} : vector<9x9xbf16>, vector<9x32xbf16>, vector<9x32xf32> -> vector<9x32xf32>
    %58 = vector.extract_strided_slice %7 {offsets = [0, 64], sizes = [9, 32], strides = [1, 1]} : vector<9x384xf32> to vector<9x32xf32>
    %59 = arith.truncf %58 : vector<9x32xf32> to vector<9x32xbf16>
    %60 = vector.extract_strided_slice %7 {offsets = [0, 192], sizes = [9, 32], strides = [1, 1]} : vector<9x384xf32> to vector<9x32xf32>
    %61 = arith.truncf %60 : vector<9x32xf32> to vector<9x32xbf16>
    %62 = vector.extract_strided_slice %7 {offsets = [0, 320], sizes = [9, 32], strides = [1, 1]} : vector<9x384xf32> to vector<9x32xf32>
    %63 = arith.truncf %62 : vector<9x32xf32> to vector<9x32xbf16>
    %cst_18 = arith.constant dense<0.000000e+00> : vector<9x9xf32>
    %64 = tpu.matmul %59, %61, %cst_18 {dimension_numbers = #tpu.dot_dimension_numbers<[1], [1], [0], [0], [0, 0, 1, 0], [], []>} : vector<9x32xbf16>, vector<9x32xbf16>, vector<9x9xf32> -> vector<9x9xf32>
    %cst_19 = arith.constant 0.176776692 : f32
    %65 = vector.broadcast %cst_19 : f32 to vector<9x9xf32>
    %66 = arith.mulf %64, %65 : vector<9x9xf32>
    %cst_20 = arith.constant dense<0xFF800000> : vector<9xf32>
    %67 = vector.multi_reduction <maximumf>, %66, %cst_20 [1] : vector<9x9xf32> to vector<9xf32>
    %68 = vector.shape_cast %67 : vector<9xf32> to vector<9x1xf32>
    %69 = vector.broadcast %68 : vector<9x1xf32> to vector<9x9xf32>
    %70 = arith.subf %66, %69 : vector<9x9xf32>
    %71 = math.exp %70 : vector<9x9xf32>
    %cst_21 = arith.constant dense<0.000000e+00> : vector<9xf32>
    %72 = vector.multi_reduction <add>, %71, %cst_21 [1] : vector<9x9xf32> to vector<9xf32>
    %73 = vector.shape_cast %72 : vector<9xf32> to vector<9x1xf32>
    %74 = tpu.reciprocal %73 {approx = true} : vector<9x1xf32> -> vector<9x1xf32>
    %75 = arith.mulf %73, %74 : vector<9x1xf32>
    %cst_22 = arith.constant 2.000000e+00 : f32
    %76 = vector.broadcast %cst_22 : f32 to vector<9x1xf32>
    %77 = arith.subf %76, %75 : vector<9x1xf32>
    %78 = arith.mulf %74, %77 : vector<9x1xf32>
    %79 = vector.broadcast %78 : vector<9x1xf32> to vector<9x9xf32>
    %80 = arith.mulf %71, %79 : vector<9x9xf32>
    %81 = arith.truncf %80 : vector<9x9xf32> to vector<9x9xbf16>
    %cst_23 = arith.constant dense<0.000000e+00> : vector<9x32xf32>
    %82 = tpu.matmul %81, %63, %cst_23 {dimension_numbers = #tpu.dot_dimension_numbers<[1], [0], [0], [1], [0, 0, 1, 1], [], []>} : vector<9x9xbf16>, vector<9x32xbf16>, vector<9x32xf32> -> vector<9x32xf32>
    %83 = vector.extract_strided_slice %7 {offsets = [0, 96], sizes = [9, 32], strides = [1, 1]} : vector<9x384xf32> to vector<9x32xf32>
    %84 = arith.truncf %83 : vector<9x32xf32> to vector<9x32xbf16>
    %85 = vector.extract_strided_slice %7 {offsets = [0, 224], sizes = [9, 32], strides = [1, 1]} : vector<9x384xf32> to vector<9x32xf32>
    %86 = arith.truncf %85 : vector<9x32xf32> to vector<9x32xbf16>
    %87 = vector.extract_strided_slice %7 {offsets = [0, 352], sizes = [9, 32], strides = [1, 1]} : vector<9x384xf32> to vector<9x32xf32>
    %88 = arith.truncf %87 : vector<9x32xf32> to vector<9x32xbf16>
    %cst_24 = arith.constant dense<0.000000e+00> : vector<9x9xf32>
    %89 = tpu.matmul %84, %86, %cst_24 {dimension_numbers = #tpu.dot_dimension_numbers<[1], [1], [0], [0], [0, 0, 1, 0], [], []>} : vector<9x32xbf16>, vector<9x32xbf16>, vector<9x9xf32> -> vector<9x9xf32>
    %cst_25 = arith.constant 0.176776692 : f32
    %90 = vector.broadcast %cst_25 : f32 to vector<9x9xf32>
    %91 = arith.mulf %89, %90 : vector<9x9xf32>
    %cst_26 = arith.constant dense<0xFF800000> : vector<9xf32>
    %92 = vector.multi_reduction <maximumf>, %91, %cst_26 [1] : vector<9x9xf32> to vector<9xf32>
    %93 = vector.shape_cast %92 : vector<9xf32> to vector<9x1xf32>
    %94 = vector.broadcast %93 : vector<9x1xf32> to vector<9x9xf32>
    %95 = arith.subf %91, %94 : vector<9x9xf32>
    %96 = math.exp %95 : vector<9x9xf32>
    %cst_27 = arith.constant dense<0.000000e+00> : vector<9xf32>
    %97 = vector.multi_reduction <add>, %96, %cst_27 [1] : vector<9x9xf32> to vector<9xf32>
    %98 = vector.shape_cast %97 : vector<9xf32> to vector<9x1xf32>
    %99 = tpu.reciprocal %98 {approx = true} : vector<9x1xf32> -> vector<9x1xf32>
    %100 = arith.mulf %98, %99 : vector<9x1xf32>
    %cst_28 = arith.constant 2.000000e+00 : f32
    %101 = vector.broadcast %cst_28 : f32 to vector<9x1xf32>
    %102 = arith.subf %101, %100 : vector<9x1xf32>
    %103 = arith.mulf %99, %102 : vector<9x1xf32>
    %104 = vector.broadcast %103 : vector<9x1xf32> to vector<9x9xf32>
    %105 = arith.mulf %96, %104 : vector<9x9xf32>
    %106 = arith.truncf %105 : vector<9x9xf32> to vector<9x9xbf16>
    %cst_29 = arith.constant dense<0.000000e+00> : vector<9x32xf32>
    %107 = tpu.matmul %106, %88, %cst_29 {dimension_numbers = #tpu.dot_dimension_numbers<[1], [0], [0], [1], [0, 0, 1, 1], [], []>} : vector<9x9xbf16>, vector<9x32xbf16>, vector<9x32xf32> -> vector<9x32xf32>
    %108 = tpu.concatenate %32, %57, %82, %107 in 1 : vector<9x32xf32>, vector<9x32xf32>, vector<9x32xf32>, vector<9x32xf32> -> vector<9x128xf32>
    %109 = arith.truncf %108 : vector<9x128xf32> to vector<9x128xbf16>
    %c0_30 = arith.constant 0 : index
    %c0_31 = arith.constant 0 : index
    %110 = vector.load %arg4[%c0_30, %c0_31] : memref<128x128xbf16, #tpu.memory_space<vmem>>, vector<128x128xbf16>
    %cst_32 = arith.constant dense<0.000000e+00> : vector<9x128xf32>
    %111 = tpu.matmul %109, %110, %cst_32 {dimension_numbers = #tpu.dot_dimension_numbers<[1], [0], [0], [1], [0, 0, 1, 1], [], []>} : vector<9x128xbf16>, vector<128x128xbf16>, vector<9x128xf32> -> vector<9x128xf32>
    %c0_33 = arith.constant 0 : index
    %c0_34 = arith.constant 0 : index
    %112 = vector.load %arg5[%c0_33, %c0_34] : memref<1x128xf32, #tpu.memory_space<vmem>>, vector<1x128xf32>
    %113 = vector.broadcast %112 : vector<1x128xf32> to vector<9x128xf32>
    %114 = arith.addf %111, %113 : vector<9x128xf32>
    %115 = arith.addf %1, %114 : vector<9x128xf32>
    %c0_35 = arith.constant 0 : index
    %c0_36 = arith.constant 0 : index
    %116 = vector.load %arg6[%c0_35, %c0_36] : memref<1x128xf32, #tpu.memory_space<vmem>>, vector<1x128xf32>
    %c0_37 = arith.constant 0 : index
    %c0_38 = arith.constant 0 : index
    %117 = vector.load %arg7[%c0_37, %c0_38] : memref<1x128xf32, #tpu.memory_space<vmem>>, vector<1x128xf32>
    %cst_39 = arith.constant dense<0.000000e+00> : vector<9xf32>
    %118 = vector.multi_reduction <add>, %115, %cst_39 [1] : vector<9x128xf32> to vector<9xf32>
    %119 = vector.shape_cast %118 : vector<9xf32> to vector<9x1xf32>
    %cst_40 = arith.constant 1.280000e+02 : f32
    %120 = vector.broadcast %cst_40 : f32 to vector<9x1xf32>
    %121 = arith.divf %119, %120 : vector<9x1xf32>
    %122 = vector.broadcast %121 : vector<9x1xf32> to vector<9x128xf32>
    %123 = arith.subf %115, %122 : vector<9x128xf32>
    %124 = arith.mulf %123, %123 : vector<9x128xf32>
    %cst_41 = arith.constant dense<0.000000e+00> : vector<9xf32>
    %125 = vector.multi_reduction <add>, %124, %cst_41 [1] : vector<9x128xf32> to vector<9xf32>
    %126 = vector.shape_cast %125 : vector<9xf32> to vector<9x1xf32>
    %cst_42 = arith.constant 1.280000e+02 : f32
    %127 = vector.broadcast %cst_42 : f32 to vector<9x1xf32>
    %128 = arith.divf %126, %127 : vector<9x1xf32>
    %129 = vector.broadcast %121 : vector<9x1xf32> to vector<9x128xf32>
    %130 = arith.subf %115, %129 : vector<9x128xf32>
    %cst_43 = arith.constant 9.99999974E-6 : f32
    %131 = vector.broadcast %cst_43 : f32 to vector<9x1xf32>
    %132 = arith.addf %128, %131 : vector<9x1xf32>
    %133 = math.rsqrt %132 : vector<9x1xf32>
    %134 = vector.broadcast %133 : vector<9x1xf32> to vector<9x128xf32>
    %135 = arith.mulf %130, %134 : vector<9x128xf32>
    %136 = vector.broadcast %116 : vector<1x128xf32> to vector<9x128xf32>
    %137 = arith.mulf %135, %136 : vector<9x128xf32>
    %138 = vector.broadcast %117 : vector<1x128xf32> to vector<9x128xf32>
    %139 = arith.addf %137, %138 : vector<9x128xf32>
    %140 = arith.truncf %139 : vector<9x128xf32> to vector<9x128xbf16>
    %c0_44 = arith.constant 0 : index
    %c0_45 = arith.constant 0 : index
    %141 = vector.load %arg8[%c0_44, %c0_45] : memref<128x2048xbf16, #tpu.memory_space<vmem>>, vector<128x2048xbf16>
    %cst_46 = arith.constant dense<0.000000e+00> : vector<9x2048xf32>
    %142 = tpu.matmul %140, %141, %cst_46 {dimension_numbers = #tpu.dot_dimension_numbers<[1], [0], [0], [1], [0, 0, 1, 1], [], []>} : vector<9x128xbf16>, vector<128x2048xbf16>, vector<9x2048xf32> -> vector<9x2048xf32>
    %c0_47 = arith.constant 0 : index
    %c0_48 = arith.constant 0 : index
    %143 = vector.load %arg9[%c0_47, %c0_48] : memref<1x2048xf32, #tpu.memory_space<vmem>>, vector<1x2048xf32>
    %144 = vector.broadcast %143 : vector<1x2048xf32> to vector<9x2048xf32>
    %145 = arith.addf %142, %144 : vector<9x2048xf32>
    %146 = arith.mulf %145, %145 : vector<9x2048xf32>
    %147 = arith.mulf %145, %146 : vector<9x2048xf32>
    %cst_49 = arith.constant 4.471500e-02 : f32
    %148 = vector.broadcast %cst_49 : f32 to vector<9x2048xf32>
    %149 = arith.mulf %148, %147 : vector<9x2048xf32>
    %150 = arith.addf %145, %149 : vector<9x2048xf32>
    %cst_50 = arith.constant 0.797884583 : f32
    %151 = vector.broadcast %cst_50 : f32 to vector<9x2048xf32>
    %152 = arith.mulf %151, %150 : vector<9x2048xf32>
    %153 = math.tanh %152 : vector<9x2048xf32>
    %cst_51 = arith.constant 1.000000e+00 : f32
    %154 = vector.broadcast %cst_51 : f32 to vector<9x2048xf32>
    %155 = arith.addf %154, %153 : vector<9x2048xf32>
    %cst_52 = arith.constant 5.000000e-01 : f32
    %156 = vector.broadcast %cst_52 : f32 to vector<9x2048xf32>
    %157 = arith.mulf %156, %155 : vector<9x2048xf32>
    %158 = arith.mulf %145, %157 : vector<9x2048xf32>
    %159 = arith.truncf %158 : vector<9x2048xf32> to vector<9x2048xbf16>
    %c0_53 = arith.constant 0 : index
    %c0_54 = arith.constant 0 : index
    %160 = vector.load %arg10[%c0_53, %c0_54] : memref<2048x128xbf16, #tpu.memory_space<vmem>>, vector<2048x128xbf16>
    %cst_55 = arith.constant dense<0.000000e+00> : vector<9x128xf32>
    %161 = tpu.matmul %159, %160, %cst_55 {dimension_numbers = #tpu.dot_dimension_numbers<[1], [0], [0], [1], [0, 0, 1, 1], [], []>} : vector<9x2048xbf16>, vector<2048x128xbf16>, vector<9x128xf32> -> vector<9x128xf32>
    %c0_56 = arith.constant 0 : index
    %c0_57 = arith.constant 0 : index
    %162 = vector.load %arg11[%c0_56, %c0_57] : memref<1x128xf32, #tpu.memory_space<vmem>>, vector<1x128xf32>
    %163 = vector.broadcast %162 : vector<1x128xf32> to vector<9x128xf32>
    %164 = arith.addf %161, %163 : vector<9x128xf32>
    %165 = arith.addf %139, %164 : vector<9x128xf32>
    %c0_58 = arith.constant 0 : index
    %c0_59 = arith.constant 0 : index
    %166 = vector.load %arg12[%c0_58, %c0_59] : memref<1x128xf32, #tpu.memory_space<vmem>>, vector<1x128xf32>
    %c0_60 = arith.constant 0 : index
    %c0_61 = arith.constant 0 : index
    %167 = vector.load %arg13[%c0_60, %c0_61] : memref<1x128xf32, #tpu.memory_space<vmem>>, vector<1x128xf32>
    %cst_62 = arith.constant dense<0.000000e+00> : vector<9xf32>
    %168 = vector.multi_reduction <add>, %165, %cst_62 [1] : vector<9x128xf32> to vector<9xf32>
    %169 = vector.shape_cast %168 : vector<9xf32> to vector<9x1xf32>
    %cst_63 = arith.constant 1.280000e+02 : f32
    %170 = vector.broadcast %cst_63 : f32 to vector<9x1xf32>
    %171 = arith.divf %169, %170 : vector<9x1xf32>
    %172 = vector.broadcast %171 : vector<9x1xf32> to vector<9x128xf32>
    %173 = arith.subf %165, %172 : vector<9x128xf32>
    %174 = arith.mulf %173, %173 : vector<9x128xf32>
    %cst_64 = arith.constant dense<0.000000e+00> : vector<9xf32>
    %175 = vector.multi_reduction <add>, %174, %cst_64 [1] : vector<9x128xf32> to vector<9xf32>
    %176 = vector.shape_cast %175 : vector<9xf32> to vector<9x1xf32>
    %cst_65 = arith.constant 1.280000e+02 : f32
    %177 = vector.broadcast %cst_65 : f32 to vector<9x1xf32>
    %178 = arith.divf %176, %177 : vector<9x1xf32>
    %179 = vector.broadcast %171 : vector<9x1xf32> to vector<9x128xf32>
    %180 = arith.subf %165, %179 : vector<9x128xf32>
    %cst_66 = arith.constant 9.99999974E-6 : f32
    %181 = vector.broadcast %cst_66 : f32 to vector<9x1xf32>
    %182 = arith.addf %178, %181 : vector<9x1xf32>
    %183 = math.rsqrt %182 : vector<9x1xf32>
    %184 = vector.broadcast %183 : vector<9x1xf32> to vector<9x128xf32>
    %185 = arith.mulf %180, %184 : vector<9x128xf32>
    %186 = vector.broadcast %166 : vector<1x128xf32> to vector<9x128xf32>
    %187 = arith.mulf %185, %186 : vector<9x128xf32>
    %188 = vector.broadcast %167 : vector<1x128xf32> to vector<9x128xf32>
    %189 = arith.addf %187, %188 : vector<9x128xf32>
    %c0_67 = arith.constant 0 : index
    %c0_68 = arith.constant 0 : index
    %c0_69 = arith.constant 0 : index
    %190 = vector.load %arg14[%c0_67, %c0_68, %c0_69] : memref<1x9x128xf32, #tpu.memory_space<vmem>>, vector<1x9x128xf32>
    %191 = vector.shape_cast %190 : vector<1x9x128xf32> to vector<9x128xf32>
    %192 = vector.shape_cast %189 : vector<9x128xf32> to vector<1x9x128xf32>
    tpu.vector_store %arg14[%c0_67, %c0_68, %c0_69], %192 {strides = array<i32>} : memref<1x9x128xf32, #tpu.memory_space<vmem>>, vector<1x9x128xf32>,
    return
  }
  func.func @transform_0(%arg0: i32) -> (i32, i32, i32) {
    %c0_i32 = arith.constant 0 : i32
    %c0_i32_0 = arith.constant 0 : i32
    %c0_i32_1 = arith.constant 0 : i32
    return %arg0, %c0_i32, %c0_i32_0 : i32, i32, i32
  }
  func.func @transform_1(%arg0: i32) -> (i32, i32) {
    %c0_i32 = arith.constant 0 : i32
    %c0_i32_0 = arith.constant 0 : i32
    %c0_i32_1 = arith.constant 0 : i32
    return %c0_i32, %c0_i32_0 : i32, i32
  }
  func.func @transform_2(%arg0: i32) -> (i32, i32) {
    %c0_i32 = arith.constant 0 : i32
    %c0_i32_0 = arith.constant 0 : i32
    %c0_i32_1 = arith.constant 0 : i32
    return %c0_i32, %c0_i32_0 : i32, i32
  }
  func.func @transform_3(%arg0: i32) -> (i32, i32) {
    %c0_i32 = arith.constant 0 : i32
    %c0_i32_0 = arith.constant 0 : i32
    %c0_i32_1 = arith.constant 0 : i32
    return %c0_i32, %c0_i32_0 : i32, i32
  }
  func.func @transform_4(%arg0: i32) -> (i32, i32) {
    %c0_i32 = arith.constant 0 : i32
    %c0_i32_0 = arith.constant 0 : i32
    %c0_i32_1 = arith.constant 0 : i32
    return %c0_i32, %c0_i32_0 : i32, i32
  }
  func.func @transform_5(%arg0: i32) -> (i32, i32) {
    %c0_i32 = arith.constant 0 : i32
    %c0_i32_0 = arith.constant 0 : i32
    %c0_i32_1 = arith.constant 0 : i32
    return %c0_i32, %c0_i32_0 : i32, i32
  }
  func.func @transform_6(%arg0: i32) -> (i32, i32) {
    %c0_i32 = arith.constant 0 : i32
    %c0_i32_0 = arith.constant 0 : i32
    %c0_i32_1 = arith.constant 0 : i32
    return %c0_i32, %c0_i32_0 : i32, i32
  }
  func.func @transform_7(%arg0: i32) -> (i32, i32) {
    %c0_i32 = arith.constant 0 : i32
    %c0_i32_0 = arith.constant 0 : i32
    %c0_i32_1 = arith.constant 0 : i32
    return %c0_i32, %c0_i32_0 : i32, i32
  }
  func.func @transform_8(%arg0: i32) -> (i32, i32) {
    %c0_i32 = arith.constant 0 : i32
    %c0_i32_0 = arith.constant 0 : i32
    %c0_i32_1 = arith.constant 0 : i32
    return %c0_i32, %c0_i32_0 : i32, i32
  }
  func.func @transform_9(%arg0: i32) -> (i32, i32) {
    %c0_i32 = arith.constant 0 : i32
    %c0_i32_0 = arith.constant 0 : i32
    %c0_i32_1 = arith.constant 0 : i32
    return %c0_i32, %c0_i32_0 : i32, i32
  }
  func.func @transform_10(%arg0: i32) -> (i32, i32) {
    %c0_i32 = arith.constant 0 : i32
    %c0_i32_0 = arith.constant 0 : i32
    %c0_i32_1 = arith.constant 0 : i32
    return %c0_i32, %c0_i32_0 : i32, i32
  }
  func.func @transform_11(%arg0: i32) -> (i32, i32) {
    %c0_i32 = arith.constant 0 : i32
    %c0_i32_0 = arith.constant 0 : i32
    %c0_i32_1 = arith.constant 0 : i32
    return %c0_i32, %c0_i32_0 : i32, i32
  }
  func.func @transform_12(%arg0: i32) -> (i32, i32) {
    %c0_i32 = arith.constant 0 : i32
    %c0_i32_0 = arith.constant 0 : i32
    %c0_i32_1 = arith.constant 0 : i32
    return %c0_i32, %c0_i32_0 : i32, i32
  }
  func.func @transform_13(%arg0: i32) -> (i32, i32, i32) {
    %c0_i32 = arith.constant 0 : i32
    %c0_i32_0 = arith.constant 0 : i32
    %c0_i32_1 = arith.constant 0 : i32
    return %arg0, %c0_i32, %c0_i32_0 : i32, i32, i32
  }
}

</mosaic_0001>

<bundles_post_ra>
// kernel: transformer_predictor_forward.2
= control target key start
LH: loop header
LB: loop body
LE: loop exit
PB: predicated region body
PF: predicated region fallthrough
CT: control target
= control target key end

     0   :  { %s5391_s25 = smov 0   ;;  %s6821_s0 = inlined_call_operand.vmem [shape: f32[2,9,128], index: 0, kind: input, shape index: {}]   ;;  %s6822_s1 = inlined_call_operand.vmem [shape: bf16[128,384], index: 1, kind: input, shape index: {}]   ;;  %s6823_s2 = inlined_call_operand.vmem [shape: f32[1,384], index: 2, kind: input, shape index: {}]   ;;  %s6824_s3 = inlined_call_operand.vmem [shape: bf16[128,128], index: 3, kind: input, shape index: {}]   ;;  %s6825_s4 = inlined_call_operand.vmem [shape: f32[1,128], index: 4, kind: input, shape index: {}]   ;;  %s6826_s5 = inlined_call_operand.vmem [shape: f32[1,128], index: 5, kind: input, shape index: {}]   ;;  %s6827_s6 = inlined_call_operand.vmem [shape: f32[1,128], index: 6, kind: input, shape index: {}]   ;;  %s6828_s7 = inlined_call_operand.vmem [shape: bf16[128,2048], index: 7, kind: input, shape index: {}]   ;;  %s6829_s8 = inlined_call_operand.vmem [shape: f32[1,2048], index: 8, kind: input, shape index: {}]   ;;  %s6830_s9 = inlined_call_operand.vmem [shape: bf16[2048,128], index: 9, kind: input, shape index: {}]   ;;  %s6831_s10 = inlined_call_operand.vmem [shape: f32[1,128], index: 10, kind: input, shape index: {}]   ;;  %s6832_s11 = inlined_call_operand.vmem [shape: f32[1,128], index: 11, kind: input, shape index: {}]   ;;  %s6833_s12 = inlined_call_operand.vmem [shape: f32[1,128], index: 12, kind: input, shape index: {}]   ;;  %s6834_s13 = inlined_call_operand.vmem [shape: f32[2,9,128], index: 13, kind: output, shape index: {}]  }
   0x1 LB: > { %s4389_s26 = sadd.s32 4294967295, %s5312_s25   ;;  %p4393_p0 = scmp.ge.s32.totalorder %s5312_s25, 1  ;;  %s5312_s25 = sphi %s5391_s25, %s23_s25  }
   0x2   : > { %p387_p1 = scmp.lt.s32.totalorder %s5312_s25, 3 }
   0x4   : > { %p388_p2 = pnand %p4393_p0, %p387_p1 }
   0x5   : > { %v5032_v0 = vld [vmem:[%s6822_s1 + $0x4] ss:$12 sps:$4 sm:$0xff] (!%p388_p2)   ;;  %v5034_v1 = vld [vmem:[%s6822_s1] ss:$12 sps:$4 sm:$0xff] (!%p388_p2)   ;;  %v5314_v2 = vmov (!%p388_p2), 0   ;;  %v5315_v4 = vmov (!%p388_p2), 0.0   ;;  %v479_v29 = vlaneseq (!%p388_p2) }
   0x6   : > { %391 = sbr.rel (%p388_p2) target bundleno = 3143 (0xc47), region = 72  ;;  %654 = vmatprep.mubr.bf16.mxu0 (!%p388_p2), %v5314_v2  ;;  %622 = vmatprep.subr.bf16.mxu0 (!%p388_p2), %v5032_v0  ;;  %v5035_v3 = vld [vmem:[%s6822_s1 + $0x1c] ss:$12 sps:$4 sm:$0xff] (!%p388_p2)   ;;  %v5037_v5 = vld [vmem:[%s6822_s1 + $0x18] ss:$12 sps:$4 sm:$0xff] (!%p388_p2)   ;;  %p431_p3 = scmp.lt.s32.totalorder (!%p388_p2), %s4389_s26, 1 }
   0x7   : > { %4914 = vmatprep.subr.bf16.mxu1 (!%p388_p2), %v5315_v4  ;;  %623 = vmatpush1.bf16.msra.mxu0 (!%p388_p2), %v5034_v1  ;;  %v5038_v6 = vld [vmem:[%s6822_s1 + $0x34] ss:$12 sps:$4 sm:$0xff] (!%p388_p2)   ;;  %v5040_v7 = vld [vmem:[%s6822_s1 + $0x30] ss:$12 sps:$4 sm:$0xff] (!%p388_p2)   ;;  %v5041_v8 = vld [vmem:[%s6822_s1 + $0x4c] ss:$12 sps:$4 sm:$0xff] (!%p388_p2)  }
   0x8   : > { %624 = vmatprep.subr.bf16.mxu0 (!%p388_p2), %v5035_v3  ;;  %v5043_v9 = vld [vmem:[%s6822_s1 + $0x48] ss:$12 sps:$4 sm:$0xff] (!%p388_p2)   ;;  %v5044_v10 = vld [vmem:[%s6822_s1 + $0x64] ss:$12 sps:$4 sm:$0xff] (!%p388_p2)   ;;  %v5057_v12 = vld [vmem:[%s6822_s1 + $0x20] ss:$12 sps:$4 sm:$0xff] (!%p388_p2)  }
   0x9   : > { %v5056_v11 = vld [vmem:[%s6822_s1 + $0x8] ss:$12 sps:$4 sm:$0xff] (!%p388_p2)   ;;  %v5046_v13 = vld [vmem:[%s6822_s1 + $0x60] ss:$12 sps:$4 sm:$0xff] (!%p388_p2)   ;;  %v5049_v15 = vld [vmem:[%s6822_s1 + $0x78] ss:$12 sps:$4 sm:$0xff] (!%p388_p2)  }
   0xa   : > { %4915 = vmatpush3.bf16.msra.mxu1 (!%p388_p2), %v5056_v11  ;;  %v5047_v14 = vld [vmem:[%s6822_s1 + $0x7c] ss:$12 sps:$4 sm:$0xff] (!%p388_p2)   ;;  %v5050_v16 = vld [vmem:[%s6822_s1 + $0x94] ss:$12 sps:$4 sm:$0xff] (!%p388_p2)   ;;  %v5058_v17 = vld [vmem:[%s6822_s1 + $0x38] ss:$12 sps:$4 sm:$0xff] (!%p388_p2)  }
   0xb   : > { %625 = vmatpush1.bf16.msra.mxu0 (!%p388_p2), %v5037_v5  ;;  %4916 = vmatprep.subr.bf16.mxu1 (!%p388_p2), %v5315_v4  ;;  %v5059_v18 = vld [vmem:[%s6822_s1 + $0x50] ss:$12 sps:$4 sm:$0xff] (!%p388_p2)   ;;  %v5053_v20 = vld [vmem:[%s6822_s1 + $0xac] ss:$12 sps:$4 sm:$0xff] (!%p388_p2)   ;;  %v5060_v21 = vld [vmem:[%s6822_s1 + $0x68] ss:$12 sps:$4 sm:$0xff] (!%p388_p2)  }
   0xc   : > { %626 = vmatprep.subr.bf16.mxu0 (!%p388_p2), %v5038_v6  ;;  %v5052_v19 = vld [vmem:[%s6822_s1 + $0x90] ss:$12 sps:$4 sm:$0xff] (!%p388_p2)   ;;  %v5055_v22 = vld [vmem:[%s6822_s1 + $0xa8] ss:$12 sps:$4 sm:$0xff] (!%p388_p2)   ;;  %v5061_v25 = vld [vmem:[%s6822_s1 + $0x80] ss:$12 sps:$4 sm:$0xff] (!%p388_p2)  }
   0xd   : > { %s6836_s26 = smov (!%p431_p3, %s4389_s26), 1  ;;  %v5062_v27 = vld [vmem:[%s6822_s1 + $0x98] ss:$12 sps:$4 sm:$0xff]   ;;  %v5063_v28 = vld [vmem:[%s6822_s1 + $0xb0] ss:$12 sps:$4 sm:$0xff]   ;;  %vm5316_vm0 = vmmov 0  }
   0xe   : > { %s4702_s15 = sshll.u32 %s6836_s26, 4  ;;  %4917 = vmatpush3.bf16.msra.mxu1 %v5057_v12  ;;  %4930 = vmatprep.mubr.msk.bf16.mxu1 %vm5316_vm0, %v5315_v4  ;;  %v5500_v30 = vshrl.u32 %v479_v29, 7  ;;  %v477_v32 = vld [vmem:[%s6823_s2] sm:$0x7]  ;;  %vm709_vm1 = vcmask 261120   ;;  %vm793_vm2 = vcmask 1043456  }
   0xf   : > { %627 = vmatpush1.bf16.msra.mxu0 %v5040_v7  ;;  %4918 = vmatprep.subr.bf16.mxu1 %v5315_v4  ;;  %s5468_s22 = scalar_lea.vmem %s6821_s0, %s4702_s15  ;;  %vm794_vm3 = vcmask 1044480   ;;  %v5317_v56 = vmov 65535   ;;  %vm759_vm4 = vcmask 72704   ;;  %vm763_vm5 = vcmask 65536   ;;  %s5318_s21 = smov 96  }
  0x10   : > { %628 = vmatprep.subr.bf16.mxu0 %v5041_v8  ;;  %v442_v23 = vld [vmem:[%s5468_s22] sm:$0xff]  ;;  %v443_v24 = vld [vmem:[%s5468_s22 + $0x8] sm:$0x1]  ;;  %v5503_v31 = vsub.s32 0, %v5500_v30  ;;  %v5509_v33 = vsub.s32 1, %v5500_v30  ;;  %v5519_v47 = vsub.s32 2, %v5500_v30  ;;  %s440_s14 = scalar_lea.vmem %s6834_s13, %s4702_s15 }
  0x11   : > { %v444_v26 = vpack.c.bf16 %v443_v24, %v442_v23  ;;  %v795_v57 = vsel %vm793_vm2, 4294967295, %v5317_v56  ;;  %s5319_s23 = smov 32   ;;  %s5320_s24 = smov 64   ;;  %vm1263_vm6 = vcmask 523264   ;;  %vm1266_vm7 = vcmask 785408  }
  0x12   : > { %4919 = vmatpush3.bf16.msra.mxu1 %v5058_v17  ;;  %v482_v34 = vrot.slane %v477_v32, %v5503_v31  ;;  %v486_v36 = vrot.slane %v477_v32, %v5509_v33  ;;  %v490_v48 = vrot.slane %v477_v32, %v5519_v47  ;;  %v5524_v58 = vsel %vm794_vm3, %v795_v57, 0 }
  0x13   : > { %629 = vmatpush1.bf16.msra.mxu0 %v5043_v9  ;;  %4920 = vmatprep.subr.bf16.mxu1 %v5315_v4  ;;  %vm1388_vm8 = vcmask 1040384  }
  0x14   : > { %630 = vmatprep.subr.bf16.mxu0 %v5044_v10 }
  0x16   : > { %4921 = vmatpush3.bf16.msra.mxu1 %v5059_v18 }
  0x17   : > { %631 = vmatpush1.bf16.msra.mxu0 %v5046_v13  ;;  %4922 = vmatprep.subr.bf16.mxu1 %v5315_v4 }
  0x18   : > { %632 = vmatprep.subr.bf16.mxu0 %v5047_v14 }
  0x1a   : > { %4923 = vmatpush3.bf16.msra.mxu1 %v5060_v21 }
  0x1b   : > { %633 = vmatpush1.bf16.msra.mxu0 %v5049_v15  ;;  %4924 = vmatprep.subr.bf16.mxu1 %v5315_v4 }
  0x1c   : > { %634 = vmatprep.subr.bf16.mxu0 %v5050_v16 }
  0x1e   : > { %4925 = vmatpush3.bf16.msra.mxu1 %v5061_v25 }
  0x1f   : > { %635 = vmatpush1.bf16.msra.mxu0 %v5052_v19  ;;  %4926 = vmatprep.subr.bf16.mxu1 %v5315_v4 }
  0x20   : > { %636 = vmatprep.subr.bf16.mxu0 %v5053_v20 }
  0x22   : > { %4927 = vmatpush3.bf16.msra.mxu1 %v5062_v27 }
  0x23   : > { %637 = vmatpush1.bf16.msra.mxu0 %v5055_v22  ;;  %4928 = vmatprep.subr.bf16.mxu1 %v5315_v4 }
  0x24   : > { %4958 = vmatprep.subr.bf16.mxu0 %v5315_v4 }
  0x26   : > { %655 = vmatmul.mubr.bf16.vlgmr.msra.gmra.mrb[0].mxu0 %v444_v26  ;;  %4929 = vmatpush3.bf16.msra.mxu1 %v5063_v28 }
  0x27   : > { %4934 = vmatprep.subr.bf16.mxu1 %v5315_v4  ;;  %4960 = vmatprep.mubr.msk.bf16.mxu0 %vm5316_vm0, %v5315_v4 }
  0x29   : > { %4931 = vmatmul.mubr.bf16.vlgmr.msra.gmra.mrb[0].mxu1 %v444_v26 }
  0x2a   : > { %4936 = vmatprep.mubr.msk.bf16.mxu1 %vm5316_vm0, %v5315_v4 }
  0xf9   : > { %v656_v35 = vpop.f32.mrb[0].mxu0 }
  0xfa   : > { %v658_v37 = vpop.f32.mrb[1].mxu0  ;;  %v657_v39 = vadd.f32 %v656_v35, %v482_v34 }
  0xfb   : > { %v660_v38 = vpop.f32.mrb[2].mxu0  ;;  %v659_v42 = vadd.f32 %v658_v37, %v486_v36 }
  0xfc   : > { %v661_v40 = vadd.f32 %v660_v38, %v482_v34  ;;  %v662_v41 = vpop.f32.mrb[3].mxu0  ;;  %v699_v49 = vpop.f32.mrb[0].mxu1 }
  0xfd   : > { %v663_v43 = vadd.f32 %v662_v41, %v486_v36  ;;  %v700_v50 = vadd.f32 %v699_v49, %v490_v48  ;;  %v4932_v51 = vpop.f32.mrb[1].mxu1 }
  0xfe   : > { %v706_v44 = vpack.c.bf16 %v661_v40, %v657_v39  ;;  %v702_v52 = vpop.f32.mrb[2].mxu1 }
  0xff   : > { %v707_v45 = vpack.c.bf16 %v663_v43, %v659_v42  ;;  %v703_v53 = vadd.f32 %v702_v52, %v490_v48  ;;  %v4933_v54 = vpop.f32.mrb[3].mxu1 }
 0x101   : > { %v714_v46 = vsel %vm709_vm1, %v707_v45, 0  ;;  %v5522_v55 = vpack.c.bf16 %v703_v53, %v700_v50 }
 0x102   : > { %4935 = vmatpush3.bf16.xpose.msra.mxu1 %v714_v46 }
 0x103   : > { %4940 = vmatprep.subr.bf16.mxu1 %v5315_v4  ;;  %v798_v59 = vand.u32 %v5524_v58, %v5522_v55 }
 0x109   : > { %4937 = vmatmul.mubr.msk.bf16.vlgmr.msra.gmra.mrb[4].mxu1 %vm709_vm1, %v706_v44 }
 0x10a   : > { %4942 = vmatprep.mubr.msk.bf16.mxu1 %vm5316_vm0, %v5315_v4  ;;  %4941 = vmatpush3.bf16.msra.mxu1 %v798_v59 }
 0x10b   : > { %4946 = vmatprep.subr.bf16.mxu1 %v5315_v4 }
 0x1dc   : > { %v750_v60 = vpop.f32.mrb[4].mxu1 }
 0x1dd   : > { %v757_v61 = vmul.f32 0.17677669, %v750_v60  ;;  %v4938_v62 = vpop.f32.mrb[5].mxu1 }
 0x1de   : > { %v753_v63 = vpop.f32.mrb[6].mxu1 }
 0x1df   : > { %v758_v0 = vmul.f32 0.17677669, %v753_v63  ;;  %v4939_v1 = vpop.f32.mrb[7].mxu1  ;;  %v760_v3 = vsel %vm759_vm4, %v757_v61, -inf }
 0x1e0   : > { %761 = vmax.xlane.f32.xlu0 %v760_v3 }
 0x1e1   : > { %v764_v5 = vsel %vm763_vm5, %v758_v0, -inf }
 0x1e4   : > { %765 = vmax.xlane.f32.xlu0 %v764_v5 }
 0x1fa   : > { %845 = vrot.lane.b32.xlu0 %v707_v45, %s5318_s21 }
 0x1fe   : > { %1108 = vrot.lane.b32.xlu0 %v707_v45, %s5319_s23 }
 0x26d   : > { %v762_v6 = vpop.xlane.xlu0 %761 }
 0x26e   : > { %v767_v7 = vsub.f32 %v757_v61, %v762_v6 }
 0x270   : > { %v769_v8 = vmul.f32 1.442695, %v767_v7 }
 0x271   : > { %v766_v9 = vpop.xlane.xlu0 %765 }
 0x272   : > { %5200 = vpow2.f32 %v769_v8  ;;  %v768_v10 = vsub.f32 %v758_v0, %v766_v9 }
 0x274   : > { %v771_v11 = vmul.f32 1.442695, %v768_v10 }
 0x275   : > { %v846_v20 = vpop.permute.xlu0 %845 }
 0x276   : > { %5202 = vpow2.f32 %v771_v11  ;;  %v851_v39 = vsel %vm709_vm1, %v846_v20, 0 }
 0x279   : > { %v1109_v27 = vpop.permute.xlu0 %1108 }
 0x27a   : > { %v1114_v35 = vsel %vm709_vm1, %v1109_v27, 0 }
 0x27c   : > { %v5201_v12 = vpop.eup %5200 }
 0x27d   : > { %v773_v13 = vsel %vm759_vm4, %v5201_v12, 0.0 }
 0x27e   : > { %774 = vadd.xlane.f32.xlu1 %v773_v13 }
 0x280   : > { %v5203_v14 = vpop.eup %5202 }
 0x281   : > { %v776_v15 = vsel %vm763_vm5, %v5203_v14, 0.0 }
 0x282   : > { %777 = vadd.xlane.f32.xlu1 %v776_v15 }
 0x293   : > { %842 = vrot.lane.b32.xlu1 %v706_v44, %s5318_s21 }
 0x297   : > { %977 = vrot.lane.b32.xlu1 %v707_v45, %s5320_s24 }
 0x29b   : > { %975 = vrot.lane.b32.xlu1 %v706_v44, %s5320_s24 }
 0x29f   : > { %1106 = vrot.lane.b32.xlu1 %v706_v44, %s5319_s23 }
 0x30b   : > { %v775_v16 = vpop.xlane.xlu1 %774 }
 0x30c   : > { %5204 = vrcp.f32 %v775_v16 }
 0x30f   : > { %v778_v17 = vpop.xlane.xlu1 %777 }
 0x310   : > { %5206 = vrcp.f32 %v778_v17 }
 0x313   : > { %v843_v18 = vpop.permute.xlu1 %842 }
 0x316   : > { %v5205_v19 = vpop.eup %5204 }
 0x317   : > { %v781_v21 = vmul.f32 %v5205_v19, %v775_v16  ;;  %v978_v22 = vpop.permute.xlu1 %977 }
 0x318   : > { %v983_v23 = vsel %vm709_vm1, %v978_v22, 0 }
 0x319   : > { %v783_v24 = vsub.f32 2.0, %v781_v21  ;;  %4959 = vmatpush3.bf16.xpose.msra.mxu0 %v983_v23 }
 0x31a   : > { %v5207_v25 = vpop.eup %5206  ;;  %4970 = vmatprep.subr.bf16.mxu0 %v5315_v4 }
 0x31b   : > { %v782_v26 = vmul.f32 %v5207_v25, %v778_v17  ;;  %v785_v28 = vmul.f32 %v5205_v19, %v783_v24  ;;  %v976_v34 = vpop.permute.xlu1 %975 }
 0x31d   : > { %v784_v29 = vsub.f32 2.0, %v782_v26  ;;  %v787_v36 = vmul.f32 %v5201_v12, %v785_v28 }
 0x31f   : > { %v786_v32 = vmul.f32 %v5207_v25, %v784_v29  ;;  %v1107_v40 = vpop.permute.xlu1 %1106 }
 0x320   : > { %4961 = vmatmul.mubr.msk.bf16.vlgmr.msra.gmra.mrb[4].mxu0 %vm709_vm1, %v976_v34 }
 0x321   : > { %v788_v37 = vmul.f32 %v5203_v14, %v786_v32  ;;  %4971 = vmatpush3.bf16.xpose.msra.mxu0 %v1114_v35  ;;  %4972 = vmatprep.mubr.msk.bf16.mxu0 %vm5316_vm0, %v5315_v4 }
 0x322   : > { %4982 = vmatprep.subr.bf16.mxu0 %v5315_v4 }
 0x323   : > { %v789_v38 = vpack.c.bf16 %v788_v37, %v787_v36 }
 0x325   : > { %4943 = vmatmul.mubr.msk.bf16.vlgmr.msra.gmra.mrb[8].mxu1 %vm759_vm4, %v789_v38 }
 0x326   : > { %4947 = vmatpush3.bf16.xpose.msra.mxu1 %v851_v39  ;;  %4948 = vmatprep.mubr.msk.bf16.mxu1 %vm5316_vm0, %v5315_v4 }
 0x327   : > { %4952 = vmatprep.subr.bf16.mxu1 %v5315_v4 }
 0x328   : > { %4973 = vmatmul.mubr.msk.bf16.vlgmr.msra.gmra.mrb[8].mxu0 %vm709_vm1, %v1107_v40 }
 0x329   : > { %4998 = vmatprep.mubr.msk.bf16.mxu0 %vm5316_vm0, %v5315_v4 }
 0x32d   : > { %4949 = vmatmul.mubr.msk.bf16.vlgmr.msra.gmra.mrb[12].mxu1 %vm709_vm1, %v843_v18 }
 0x32e   : > { %4954 = vmatprep.mubr.msk.bf16.mxu1 %vm5316_vm0, %v5315_v4 }
 0x3f3   : > { %v1019_v41 = vpop.f32.mrb[4].mxu0 }
 0x3f4   : > { %v4962_v42 = vpop.f32.mrb[5].mxu0  ;;  %v1026_v60 = vmul.f32 0.17677669, %v1019_v41 }
 0x3f5   : > { %v1022_v43 = vpop.f32.mrb[6].mxu0 }
 0x3f6   : > { %v4963_v44 = vpop.f32.mrb[7].mxu0  ;;  %v1027_v3 = vmul.f32 0.17677669, %v1022_v43  ;;  %v1028_v5 = vsel %vm759_vm4, %v1026_v60, -inf }
 0x3f8   : > { %v5557_v45 = vpop.f32.mrb[8].mxu1  ;;  %v1031_v8 = vsel %vm763_vm5, %v1027_v3, -inf }
 0x3f9   : > { %v4944_v46 = vpop.f32.mrb[9].mxu1 }
 0x3fa   : > { %v5559_v48 = vpop.f32.mrb[10].mxu1 }
 0x3fb   : > { %v4945_v49 = vpop.f32.mrb[11].mxu1  ;;  %v1150_v50 = vpop.f32.mrb[8].mxu0 }
 0x3fc   : > { %v4974_v51 = vpop.f32.mrb[9].mxu0  ;;  %v1157_v7 = vmul.f32 0.17677669, %v1150_v50 }
 0x3fd   : > { %v1153_v52 = vpop.f32.mrb[10].mxu0 }
 0x3fe   : > { %v4975_v53 = vpop.f32.mrb[11].mxu0  ;;  %v1158_v0 = vmul.f32 0.17677669, %v1153_v52  ;;  %v1159_v9 = vsel %vm759_vm4, %v1157_v7, -inf }
 0x400   : > { %v887_v54 = vpop.f32.mrb[12].mxu1  ;;  %v1162_v6 = vsel %vm763_vm5, %v1158_v0, -inf }
 0x401   : > { %v894_v56 = vmul.f32 0.17677669, %v887_v54  ;;  %v4950_v57 = vpop.f32.mrb[13].mxu1 }
 0x402   : > { %v890_v59 = vpop.f32.mrb[14].mxu1 }
 0x403   : > { %v895_v61 = vmul.f32 0.17677669, %v890_v59  ;;  %v4951_v62 = vpop.f32.mrb[15].mxu1  ;;  %v896_v63 = vsel %vm759_vm4, %v894_v56, -inf }
 0x404   : > { %897 = vmax.xlane.f32.xlu0 %v896_v63 }
 0x405   : > { %v899_v1 = vsel %vm763_vm5, %v895_v61, -inf }
 0x406   : > { %900 = vmax.xlane.f32.xlu1 %v899_v1 }
 0x408   : > { %1029 = vmax.xlane.f32.xlu0 %v1028_v5 }
 0x40a   : > { %1163 = vmax.xlane.f32.xlu1 %v1162_v6 }
 0x40c   : > { %1032 = vmax.xlane.f32.xlu0 %v1031_v8 }
 0x410   : > { %1160 = vmax.xlane.f32.xlu0 %v1159_v9 }
 0x491   : > { %v898_v10 = vpop.xlane.xlu0 %897 }
 0x492   : > { %v902_v19 = vsub.f32 %v894_v56, %v898_v10 }
 0x493   : > { %v901_v11 = vpop.xlane.xlu1 %900 }
 0x494   : > { %v903_v14 = vsub.f32 %v895_v61, %v901_v11  ;;  %v904_v25 = vmul.f32 1.442695, %v902_v19 }
 0x495   : > { %v1030_v12 = vpop.xlane.xlu0 %1029 }
 0x496   : > { %v1034_v13 = vsub.f32 %v1026_v60, %v1030_v12  ;;  %v906_v20 = vmul.f32 1.442695, %v903_v14 }
 0x497   : > { %v1164_v16 = vpop.xlane.xlu1 %1163 }
 0x498   : > { %v1036_v15 = vmul.f32 1.442695, %v1034_v13  ;;  %v1166_v21 = vsub.f32 %v1158_v0, %v1164_v16 }
 0x499   : > { %v1033_v17 = vpop.xlane.xlu0 %1032 }
 0x49a   : > { %5208 = vpow2.f32 %v1036_v15  ;;  %v1035_v18 = vsub.f32 %v1027_v3, %v1033_v17  ;;  %v1169_v26 = vmul.f32 1.442695, %v1166_v21 }
 0x49c   : > { %v1038_v22 = vmul.f32 1.442695, %v1035_v18 }
 0x49d   : > { %v1161_v23 = vpop.xlane.xlu0 %1160 }
 0x49e   : > { %5210 = vpow2.f32 %v1038_v22  ;;  %v1165_v24 = vsub.f32 %v1157_v7, %v1161_v23 }
 0x49f   : > { %5212 = vpow2.f32 %v906_v20 }
 0x4a0   : > { %v1167_v27 = vmul.f32 1.442695, %v1165_v24 }
 0x4a2   : > { %5214 = vpow2.f32 %v1167_v27 }
 0x4a3   : > { %5216 = vpow2.f32 %v904_v25 }
 0x4a4   : > { %v5567_v28 = vpop.eup %5208  ;;  %5218 = vpow2.f32 %v1169_v26 }
 0x4a5   : > { %v1040_v29 = vsel %vm759_vm4, %v5567_v28, 0.0 }
 0x4a6   : > { %1041 = vadd.xlane.f32.xlu0 %v1040_v29 }
 0x4a8   : > { %v5211_v32 = vpop.eup %5210 }
 0x4a9   : > { %v1043_v34 = vsel %vm763_vm5, %v5211_v32, 0.0  ;;  %v5213_v35 = vpop.eup %5212 }
 0x4aa   : > { %1044 = vadd.xlane.f32.xlu1 %v1043_v34  ;;  %v911_v39 = vsel %vm763_vm5, %v5213_v35, 0.0  ;;  %v5066_v34 = vld [vmem:[%s6824_s3 + $0x10] sm:$0xff]  }
 0x4ac   : > { %v5572_v36 = vpop.eup %5214 }
 0x4ad   : > { %v5217_v37 = vpop.eup %5216  ;;  %v1171_v38 = vsel %vm759_vm4, %v5572_v36, 0.0 }
 0x4ae   : > { %v5577_v40 = vpop.eup %5218  ;;  %1172 = vadd.xlane.f32.xlu0 %v1171_v38  ;;  %912 = vadd.xlane.f32.xlu1 %v911_v39  ;;  %v908_v41 = vsel %vm759_vm4, %v5217_v37, 0.0  ;;  %v5069_v39 = vld [vmem:[%s6824_s3 + $0x28] sm:$0xff]  }
 0x4af   : > { %v1174_v42 = vsel %vm763_vm5, %v5577_v40, 0.0 }
 0x4b2   : > { %909 = vadd.xlane.f32.xlu0 %v908_v41  ;;  %1175 = vadd.xlane.f32.xlu1 %v1174_v42 }
 0x4c3   : > { %1057 = vrot.lane.b32.xlu1 %v5522_v55, %s5320_s24 }
 0x4c7   : > { %1188 = vrot.lane.b32.xlu1 %v5522_v55, %s5319_s23 }
 0x4c8   : > { %926 = vrot.lane.b32.xlu0 %v5522_v55, %s5318_s21 }
 0x533   : > { %v1042_v43 = vpop.xlane.xlu0 %1041 }
 0x537   : > { %v1045_v44 = vpop.xlane.xlu1 %1044 }
 0x53b   : > { %v1173_v46 = vpop.xlane.xlu0 %1172  ;;  %v913_v49 = vpop.xlane.xlu1 %912 }
 0x53c   : > { %5220 = vrcp.f32 %v913_v49 }
 0x53d   : > { %5222 = vrcp.f32 %v1045_v44 }
 0x53e   : > { %5224 = vrcp.f32 %v1042_v43 }
 0x53f   : > { %v910_v50 = vpop.xlane.xlu0 %909  ;;  %v1176_v51 = vpop.xlane.xlu1 %1175 }
 0x540   : > { %5226 = vrcp.f32 %v910_v50 }
 0x541   : > { %5228 = vrcp.f32 %v1176_v51 }
 0x542   : > { %5230 = vrcp.f32 %v1173_v46 }
 0x543   : > { %v927_v52 = vpop.permute.xlu0 %926  ;;  %v1058_v10 = vpop.permute.xlu1 %1057 }
 0x544   : > { %v932_v53 = vand.u32 %v927_v52, %v5524_v58  ;;  %v1063_v15 = vand.u32 %v1058_v10, %v5524_v58 }
 0x546   : > { %4953 = vmatpush3.bf16.msra.mxu1 %v932_v53  ;;  %v5221_v54 = vpop.eup %5220 }
 0x547   : > { %4964 = vmatprep.subr.bf16.mxu1 %v5315_v4  ;;  %v5223_v56 = vpop.eup %5222  ;;  %v917_v55 = vmul.f32 %v5221_v54, %v913_v49  ;;  %v1189_v22 = vpop.permute.xlu1 %1188  ;;  %v5071_v49 = vld [vmem:[%s6824_s3 + $0x38] sm:$0xff]  }
 0x548   : > { %v5225_v57 = vpop.eup %5224  ;;  %v1049_v61 = vmul.f32 %v5223_v56, %v1045_v44  ;;  %v1194_v25 = vand.u32 %v1189_v22, %v5524_v58  ;;  %v5064_v58 = vld [vmem:[%s6824_s3] sm:$0xff]  }
 0x549   : > { %v919_v60 = vsub.f32 2.0, %v917_v55  ;;  %v1048_v63 = vmul.f32 %v5225_v57, %v1042_v43  ;;  %4983 = vmatpush3.bf16.msra.mxu0 %v5064_v58  ;;  %v5070_v43 = vld [vmem:[%s6824_s3 + $0x30] sm:$0xff]   ;;  %v1429_v22 = vld [vmem:[%s6828_s7] sm:$0xff] }
 0x54a   : > { %v5227_v59 = vpop.eup %5226  ;;  %v1051_v3 = vsub.f32 2.0, %v1049_v61  ;;  %4984 = vmatprep.subr.bf16.mxu0 %v5315_v4 }
 0x54b   : > { %v916_v62 = vmul.f32 %v5227_v59, %v910_v50  ;;  %v921_v0 = vmul.f32 %v5221_v54, %v919_v60  ;;  %v5229_v6 = vpop.eup %5228  ;;  %v1050_v7 = vsub.f32 2.0, %v1048_v63 }
 0x54c   : > { %v5231_v11 = vpop.eup %5230  ;;  %v1053_v12 = vmul.f32 %v5223_v56, %v1051_v3  ;;  %v1180_v14 = vmul.f32 %v5229_v6, %v1176_v51 }
 0x54d   : > { %v918_v1 = vsub.f32 2.0, %v916_v62  ;;  %v923_v8 = vmul.f32 %v5213_v35, %v921_v0  ;;  %v1052_v16 = vmul.f32 %v5225_v57, %v1050_v7  ;;  %v1179_v17 = vmul.f32 %v5231_v11, %v1173_v46  ;;  %v5067_v35 = vld [vmem:[%s6824_s3 + $0x18] sm:$0xff]  }
 0x54e   : > { %v1055_v18 = vmul.f32 %v5211_v32, %v1053_v12  ;;  %v1182_v19 = vsub.f32 2.0, %v1180_v14  ;;  %v4430_v12 = vld [vmem:[%s6825_s4] ss:$0 sm:$0xff] }
 0x54f   : > { %v920_v5 = vmul.f32 %v5227_v59, %v918_v1  ;;  %v1054_v20 = vmul.f32 %v5567_v28, %v1052_v16  ;;  %v1181_v21 = vsub.f32 2.0, %v1179_v17  ;;  %v5065_v28 = vld [vmem:[%s6824_s3 + $0x8] sm:$0xff]   ;;  %v5304_v17 = vld [vmem:[%s5468_s22] sm:$0xff] }
 0x550   : > { %v1184_v24 = vmul.f32 %v5229_v6, %v1182_v19  ;;  %4985 = vmatpush3.bf16.msra.mxu0 %v5065_v28  ;;  %v5305_v19 = vld [vmem:[%s5468_s22 + $0x8] sm:$0x1] }
 0x551   : > { %v922_v9 = vmul.f32 %v5217_v37, %v920_v5  ;;  %v1056_v23 = vpack.c.bf16 %v1055_v18, %v1054_v20  ;;  %v1183_v26 = vmul.f32 %v5231_v11, %v1181_v21  ;;  %4986 = vmatprep.subr.bf16.mxu0 %v5315_v4 }
 0x552   : > { %v1186_v27 = vmul.f32 %v5577_v40, %v1184_v24  ;;  %v1430_v24 = vld [vmem:[%s6828_s7 + $0x8] sm:$0xff] }
 0x553   : > { %v924_v13 = vpack.c.bf16 %v923_v8, %v922_v9  ;;  %v1185_v29 = vmul.f32 %v5572_v36, %v1183_v26  ;;  %v5068_v36 = vld [vmem:[%s6824_s3 + $0x20] sm:$0xff]  }
 0x554   : > { %4987 = vmatpush3.bf16.msra.mxu0 %v5066_v34 }
 0x555   : > { %4955 = vmatmul.mubr.msk.bf16.vlgmr.msra.gmra.mrb[16].mxu1 %vm759_vm4, %v924_v13  ;;  %v1187_v32 = vpack.c.bf16 %v1186_v27, %v1185_v29  ;;  %4988 = vmatprep.subr.bf16.mxu0 %v5315_v4  ;;  %v1438_v27 = vld [vmem:[%s6828_s7 + $0x48] sm:$0xff]  ;;  %v1445_v29 = vld [vmem:[%s6828_s7 + $0x80] sm:$0xff] }
 0x556   : > { %4965 = vmatpush3.bf16.msra.mxu1 %v1063_v15  ;;  %4966 = vmatprep.mubr.msk.bf16.mxu1 %vm5316_vm0, %v5315_v4  ;;  %v4443_v58 = vcombine.low %v1430_v24, %v1438_v27  ;;  %v4444_v28 = vcombine.high %v1430_v24, %v1438_v27  ;;  %v1534_v24 = vld [vmem:[%s6828_s7 + $0x348] sm:$0xff] }
 0x557   : > { %4976 = vmatprep.subr.bf16.mxu1 %v5315_v4 }
 0x558   : > { %4989 = vmatpush3.bf16.msra.mxu0 %v5067_v35  ;;  %v1446_v35 = vld [vmem:[%s6828_s7 + $0x88] sm:$0xff] }
 0x559   : > { %4990 = vmatprep.subr.bf16.mxu0 %v5315_v4 }
 0x55c   : > { %4991 = vmatpush3.bf16.msra.mxu0 %v5068_v36  ;;  %v1454_v36 = vld [vmem:[%s6828_s7 + $0xc8] sm:$0xff] }
 0x55d   : > { %4967 = vmatmul.mubr.msk.bf16.vlgmr.msra.gmra.mrb[20].mxu1 %vm759_vm4, %v1056_v23  ;;  %4992 = vmatprep.subr.bf16.mxu0 %v5315_v4  ;;  %v1437_v23 = vld [vmem:[%s6828_s7 + $0x40] sm:$0xff] }
 0x55e   : > { %4977 = vmatpush3.bf16.msra.mxu1 %v1194_v25  ;;  %4978 = vmatprep.mubr.msk.bf16.mxu1 %vm5316_vm0, %v5315_v4  ;;  %v4441_v25 = vcombine.low %v1429_v22, %v1437_v23  ;;  %v4442_v26 = vcombine.high %v1429_v22, %v1437_v23  ;;  %v1526_v22 = vld [vmem:[%s6828_s7 + $0x308] sm:$0xff] }
 0x55f   : > { %v4540_v27 = vcombine.high %v1526_v22, %v1534_v24 }
 0x560   : > { %4993 = vmatpush3.bf16.msra.mxu0 %v5069_v39  ;;  %2281 = vmatprep.subr.bf16.mxu1 %v4442_v26  ;;  %v4459_v39 = vcombine.low %v1446_v35, %v1454_v36  ;;  %v4539_v26 = vcombine.low %v1526_v22, %v1534_v24  ;;  %v1495_v24 = vld [vmem:[%s6828_s7 + $0x210] sm:$0xff] }
 0x561   : > { %4994 = vmatprep.subr.bf16.mxu0 %v5315_v4 }
 0x564   : > { %4995 = vmatpush3.bf16.msra.mxu0 %v5070_v43 }
 0x565   : > { %4979 = vmatmul.mubr.msk.bf16.vlgmr.msra.gmra.mrb[24].mxu1 %vm759_vm4, %v1187_v32  ;;  %4996 = vmatprep.subr.bf16.mxu0 %v5315_v4  ;;  %v1453_v32 = vld [vmem:[%s6828_s7 + $0xc0] sm:$0xff] }
 0x566   : > { %2313 = vmatprep.mubr.bf16.mxu1 %v5314_v2  ;;  %v4458_v34 = vcombine.high %v1445_v29, %v1453_v32  ;;  %2282 = vmatpush1.bf16.msra.mxu1 %v4441_v25 }
 0x568   : > { %4997 = vmatpush3.bf16.msra.mxu0 %v5071_v49  ;;  %2283 = vmatprep.subr.bf16.mxu1 %v4458_v34  ;;  %v1550_v34 = vld [vmem:[%s6828_s7 + $0x3c8] sm:$0xff] }
 0x569   : > { %2324 = vmatprep.subr.bf16.mxu0 %v4444_v28 }
 0x628   : > { %v968_v37 = vpop.f32.mrb[16].mxu1 }
 0x629   : > { %v4956_v38 = vpop.f32.mrb[17].mxu1 }
 0x62a   : > { %v971_v40 = vpop.f32.mrb[18].mxu1  ;;  %v4457_v38 = vcombine.low %v1445_v29, %v1453_v32  ;;  %v1541_v29 = vld [vmem:[%s6828_s7 + $0x380] sm:$0xff] }
 0x62b   : > { %v5017_v41 = vpack.i.bf16 %v971_v40, %v968_v37  ;;  %v4957_v42 = vpop.f32.mrb[19].mxu1  ;;  %v4460_v37 = vcombine.high %v1446_v35, %v1454_v36  ;;  %v1549_v32 = vld [vmem:[%s6828_s7 + $0x3c0] sm:$0xff] }
 0x62c   : > { %2284 = vmatpush1.bf16.msra.mxu1 %v4457_v38  ;;  %v4554_v28 = vcombine.high %v1541_v29, %v1549_v32  ;;  %v4553_v35 = vcombine.low %v1541_v29, %v1549_v32  ;;  %v1431_v38 = vld [vmem:[%s6828_s7 + $0x10] sm:$0xff] }
 0x62d   : > { %5018 = vrot.lane.b32.xlu1 %v5017_v41, %s5319_s23 }
 0x630   : > { %v1099_v44 = vpop.f32.mrb[20].mxu1 }
 0x631   : > { %v4968_v46 = vpop.f32.mrb[21].mxu1 }
 0x632   : > { %v1102_v50 = vpop.f32.mrb[22].mxu1 }
 0x633   : > { %v5022_v51 = vpack.i.bf16 %v1102_v50, %v1099_v44  ;;  %v4969_v52 = vpop.f32.mrb[23].mxu1 }
 0x634   : > { %v1461_v52 = vld [vmem:[%s6828_s7 + $0x100] sm:$0xff] }
 0x635   : > { %5023 = vrot.lane.b32.xlu0 %v5022_v51, %s5320_s24 }
 0x638   : > { %v1230_v53 = vpop.f32.mrb[24].mxu1 }
 0x639   : > { %v4980_v54 = vpop.f32.mrb[25].mxu1 }
 0x63a   : > { %v1233_v56 = vpop.f32.mrb[26].mxu1  ;;  %v1462_v54 = vld [vmem:[%s6828_s7 + $0x108] sm:$0xff] }
 0x63b   : > { %v5027_v55 = vpack.i.bf16 %v1233_v56, %v1230_v53  ;;  %v4981_v57 = vpop.f32.mrb[27].mxu1  ;;  %v1469_v53 = vld [vmem:[%s6828_s7 + $0x140] sm:$0xff] }
 0x63c   : > { %v4474_v56 = vcombine.high %v1461_v52, %v1469_v53  ;;  %v4473_v57 = vcombine.low %v1461_v52, %v1469_v53 }
 0x63d   : > { %5028 = vrot.lane.b32.xlu1 %v5027_v55, %s5318_s21  ;;  %v1470_v55 = vld [vmem:[%s6828_s7 + $0x148] sm:$0xff] }
 0x63e   : > { %2285 = vmatprep.subr.bf16.mxu1 %v4474_v56 }
 0x63f   : > { %2286 = vmatpush1.bf16.msra.mxu1 %v4473_v57 }
 0x69f   : > { %v5019_v59 = vpop.permute.xlu1 %5018 }
 0x6a0   : > { %v5021_v60 = vunpack.i.h.bf16 %v5019_v59  ;;  %v5020_v61 = vunpack.i.l.bf16 %v5019_v59  ;;  %v4475_v59 = vcombine.low %v1462_v54, %v1470_v55 }
 0x6a2   : > { %v1262_v1 = vsel %vm709_vm1, %v5559_v48, %v5021_v60  ;;  %v1261_v3 = vsel %vm709_vm1, %v5557_v45, %v5020_v61  ;;  %v1477_v60 = vld [vmem:[%s6828_s7 + $0x180] sm:$0xff] }
 0x6a3   : > { %v1485_v61 = vld [vmem:[%s6828_s7 + $0x1c0] sm:$0xff] }
 0x6a7   : > { %v5024_v4 = vpop.permute.xlu0 %5023 }
 0x6a8   : > { %v5026_v62 = vunpack.i.h.bf16 %v5024_v4  ;;  %v5025_v63 = vunpack.i.l.bf16 %v5024_v4  ;;  %v4476_v4 = vcombine.high %v1462_v54, %v1470_v55 }
 0x6aa   : > { %v1265_v7 = vsel %vm1263_vm6, %v1262_v1, %v5026_v62  ;;  %v1264_v8 = vsel %vm1263_vm6, %v1261_v3, %v5025_v63  ;;  %v1478_v62 = vld [vmem:[%s6828_s7 + $0x188] sm:$0xff]  ;;  %v4490_v63 = vcombine.high %v1477_v60, %v1485_v61  ;;  %v4489_v1 = vcombine.low %v1477_v60, %v1485_v61 }
 0x6ac   : > { %2287 = vmatprep.subr.bf16.mxu1 %v4490_v63  ;;  %v4440_v63 = vld [vmem:[%s6827_s6] ss:$0 sm:$0xff] }
 0x6ad   : > { %2288 = vmatpush1.bf16.msra.mxu1 %v4489_v1  ;;  %v1447_v1 = vld [vmem:[%s6828_s7 + $0x90] sm:$0xff] }
 0x6af   : > { %v5029_v0 = vpop.permute.xlu1 %5028 }
 0x6b0   : > { %v5031_v5 = vunpack.i.h.bf16 %v5029_v0  ;;  %v5030_v6 = vunpack.i.l.bf16 %v5029_v0  ;;  %v1486_v0 = vld [vmem:[%s6828_s7 + $0x1c8] sm:$0xff] }
 0x6b1   : > { %v4491_v3 = vcombine.low %v1478_v62, %v1486_v0 }
 0x6b2   : > { %v1268_v9 = vsel %vm1266_vm7, %v1265_v7, %v5031_v5  ;;  %v1267_v10 = vsel %vm1266_vm7, %v1264_v8, %v5030_v6  ;;  %v4492_v5 = vcombine.high %v1478_v62, %v1486_v0  ;;  %v1493_v6 = vld [vmem:[%s6828_s7 + $0x200] sm:$0xff]  ;;  %v1494_v8 = vld [vmem:[%s6828_s7 + $0x208] sm:$0xff] }
 0x6b3   : > { %v1269_v11 = vpack.c.bf16 %v1268_v9, %v1267_v10  ;;  %v1501_v7 = vld [vmem:[%s6828_s7 + $0x240] sm:$0xff]  ;;  %v1502_v10 = vld [vmem:[%s6828_s7 + $0x248] sm:$0xff] }
 0x6b4   : > { %v4506_v9 = vcombine.high %v1493_v6, %v1501_v7 }
 0x6b5   : > { %4999 = vmatmul.mubr.bf16.vlgmr.msra.gmra.mrb[12].mxu0 %v1269_v11  ;;  %v4505_v11 = vcombine.low %v1493_v6, %v1501_v7 }
 0x6b6   : > { %2356 = vmatprep.mubr.bf16.mxu0 %v5314_v2  ;;  %2325 = vmatpush1.bf16.msra.mxu0 %v4443_v58  ;;  %v1542_v58 = vld [vmem:[%s6828_s7 + $0x388] sm:$0xff] }
 0x6b7   : > { %2326 = vmatprep.subr.bf16.mxu0 %v4460_v37  ;;  %2289 = vmatprep.subr.bf16.mxu1 %v4506_v9  ;;  %v4555_v36 = vcombine.low %v1542_v58, %v1550_v34  ;;  %v4556_v37 = vcombine.high %v1542_v58, %v1550_v34  ;;  %v1511_v34 = vld [vmem:[%s6828_s7 + $0x290] sm:$0xff] }
 0x6b8   : > { %2290 = vmatpush1.bf16.msra.mxu1 %v4505_v11  ;;  %v1471_v11 = vld [vmem:[%s6828_s7 + $0x150] sm:$0xff] }
 0x6ba   : > { %2327 = vmatpush1.bf16.msra.mxu0 %v4459_v39  ;;  %v1439_v39 = vld [vmem:[%s6828_s7 + $0x50] sm:$0xff] }
 0x6bb   : > { %2328 = vmatprep.subr.bf16.mxu0 %v4476_v4  ;;  %v4439_v4 = vld [vmem:[%s6826_s5] ss:$0 sm:$0xff] }
 0x6be   : > { %2329 = vmatpush1.bf16.msra.mxu0 %v4475_v59 }
 0x6bf   : > { %2330 = vmatprep.subr.bf16.mxu0 %v4492_v5 }
 0x6c2   : > { %2331 = vmatpush1.bf16.msra.mxu0 %v4491_v3  ;;  %v1448_v3 = vld [vmem:[%s6828_s7 + $0x98] sm:$0xff] }
 0x788   : > { %v1375_v48 = vpop.f32.mrb[12].mxu0 }
 0x789   : > { %v1376_v13 = vadd.f32 %v4430_v12, %v1375_v48  ;;  %v5000_v14 = vpop.f32.mrb[13].mxu0  ;;  %v4508_v48 = vcombine.high %v1494_v8, %v1502_v10 }
 0x78a   : > { %v1378_v45 = vpop.f32.mrb[14].mxu0  ;;  %v1517_v14 = vld [vmem:[%s6828_s7 + $0x2c0] sm:$0xff] }
 0x78b   : > { %v1379_v15 = vadd.f32 %v4430_v12, %v1378_v45  ;;  %v5001_v16 = vpop.f32.mrb[15].mxu0  ;;  %v1382_v18 = vadd.f32 %v5304_v17, %v1376_v13  ;;  %v4507_v12 = vcombine.low %v1494_v8, %v1502_v10  ;;  %2332 = vmatprep.subr.bf16.mxu0 %v4508_v48  ;;  %v1509_v13 = vld [vmem:[%s6828_s7 + $0x280] sm:$0xff]  ;;  %v1510_v45 = vld [vmem:[%s6828_s7 + $0x288] sm:$0xff]  ;;  %v1463_v10 = vld [vmem:[%s6828_s7 + $0x110] sm:$0xff] }
 0x78c   : > { %v1518_v16 = vld [vmem:[%s6828_s7 + $0x2c8] sm:$0xff]  ;;  %v4521_v17 = vcombine.low %v1509_v13, %v1517_v14  ;;  %v1472_v48 = vld [vmem:[%s6828_s7 + $0x158] sm:$0xff] }
 0x78d   : > { %1386 = vadd.xlane.f32.xlu1 %v1382_v18  ;;  %v1383_v20 = vadd.f32 %v5305_v19, %v1379_v15  ;;  %2333 = vmatpush1.bf16.msra.mxu0 %v4507_v12  ;;  %v4522_v15 = vcombine.high %v1509_v13, %v1517_v14  ;;  %v4524_v19 = vcombine.high %v1510_v45, %v1518_v16  ;;  %v1464_v12 = vld [vmem:[%s6828_s7 + $0x118] sm:$0xff] }
 0x78f   : > { %v1389_v21 = vsel %vm1388_vm8, %v1383_v20, 0.0  ;;  %2291 = vmatprep.subr.bf16.mxu1 %v4522_v15  ;;  %2334 = vmatprep.subr.bf16.mxu0 %v4524_v19  ;;  %v4480_v15 = vcombine.high %v1464_v12, %v1472_v48  ;;  %v1488_v19 = vld [vmem:[%s6828_s7 + $0x1d8] sm:$0xff] }
 0x790   : > { %1390 = vadd.xlane.f32.xlu0 %v1389_v21  ;;  %2292 = vmatpush1.bf16.msra.mxu1 %v4521_v17  ;;  %v1533_v21 = vld [vmem:[%s6828_s7 + $0x340] sm:$0xff]  ;;  %v1487_v17 = vld [vmem:[%s6828_s7 + $0x1d0] sm:$0xff] }
 0x81a   : > { %v1387_v40 = vpop.xlane.xlu1 %1386 }
 0x81b   : > { %v1393_v41 = vmul.f32 0.0078125, %v1387_v40  ;;  %v1432_v40 = vld [vmem:[%s6828_s7 + $0x18] sm:$0xff] }
 0x81d   : > { %v5673_v42 = vsub.f32 %v1382_v18, %v1393_v41  ;;  %v1391_v43 = vpop.xlane.xlu0 %1390  ;;  %v4523_v18 = vcombine.low %v1510_v45, %v1518_v16  ;;  %v4445_v41 = vcombine.low %v1431_v38, %v1439_v39  ;;  %v4478_v45 = vcombine.high %v1463_v10, %v1471_v11  ;;  %v1479_v16 = vld [vmem:[%s6828_s7 + $0x190] sm:$0xff] }
 0x81e   : > { %v1394_v44 = vmul.f32 0.0078125, %v1391_v43  ;;  %v4446_v43 = vcombine.high %v1431_v38, %v1439_v39  ;;  %v4494_v22 = vcombine.high %v1479_v16, %v1487_v17  ;;  %v4493_v29 = vcombine.low %v1479_v16, %v1487_v17  ;;  %v1465_v16 = vld [vmem:[%s6828_s7 + $0x120] sm:$0xff] }
 0x81f   : > { %v1397_v46 = vmul.f32 %v5673_v42, %v5673_v42  ;;  %2335 = vmatpush1.bf16.msra.mxu0 %v4523_v18  ;;  %v1480_v18 = vld [vmem:[%s6828_s7 + $0x198] sm:$0xff]  ;;  %v1473_v17 = vld [vmem:[%s6828_s7 + $0x160] sm:$0xff] }
 0x820   : > { %v5677_v49 = vsub.f32 %v1383_v20, %v1394_v44  ;;  %v1525_v20 = vld [vmem:[%s6828_s7 + $0x300] sm:$0xff]  ;;  %2336 = vmatprep.subr.bf16.mxu0 %v4540_v27  ;;  %v1440_v44 = vld [vmem:[%s6828_s7 + $0x58] sm:$0xff]  ;;  %v4495_v32 = vcombine.low %v1480_v18, %v1488_v19 }
 0x821   : > { %1399 = vadd.xlane.f32.xlu0 %v1397_v46  ;;  %v4538_v23 = vcombine.high %v1525_v20, %v1533_v21  ;;  %v4537_v25 = vcombine.low %v1525_v20, %v1533_v21  ;;  %v4447_v46 = vcombine.low %v1432_v40, %v1440_v44  ;;  %v4477_v20 = vcombine.low %v1463_v10, %v1471_v11  ;;  %v1504_v27 = vld [vmem:[%s6828_s7 + $0x258] sm:$0xff]  ;;  %v1449_v10 = vld [vmem:[%s6828_s7 + $0xa0] sm:$0xff] }
 0x822   : > { %v1398_v50 = vmul.f32 %v5677_v49, %v5677_v49  ;;  %v4479_v21 = vcombine.low %v1464_v12, %v1472_v48  ;;  %v1457_v11 = vld [vmem:[%s6828_s7 + $0xe0] sm:$0xff]  ;;  %v1450_v12 = vld [vmem:[%s6828_s7 + $0xa8] sm:$0xff] }
 0x823   : > { %2293 = vmatprep.subr.bf16.mxu1 %v4538_v23  ;;  %2337 = vmatpush1.bf16.msra.mxu0 %v4539_v26  ;;  %v4496_v23 = vcombine.high %v1480_v18, %v1488_v19  ;;  %v1496_v26 = vld [vmem:[%s6828_s7 + $0x218] sm:$0xff]  ;;  %v1458_v48 = vld [vmem:[%s6828_s7 + $0xe8] sm:$0xff] }
 0x824   : > { %v1401_v51 = vsel %vm1388_vm8, %v1398_v50, 0.0  ;;  %2294 = vmatpush1.bf16.msra.mxu1 %v4537_v25  ;;  %2338 = vmatprep.subr.bf16.mxu0 %v4556_v37  ;;  %v4448_v50 = vcombine.high %v1432_v40, %v1440_v44  ;;  %v1503_v25 = vld [vmem:[%s6828_s7 + $0x250] sm:$0xff]  ;;  %v1520_v37 = vld [vmem:[%s6828_s7 + $0x2d8] sm:$0xff]  ;;  %v4511_v39 = vcombine.low %v1496_v26, %v1504_v27  ;;  %v1466_v18 = vld [vmem:[%s6828_s7 + $0x128] sm:$0xff] }
 0x825   : > { %1402 = vadd.xlane.f32.xlu0 %v1401_v51  ;;  %2295 = vmatprep.subr.bf16.mxu1 %v4554_v28  ;;  %v4510_v58 = vcombine.high %v1495_v24, %v1503_v25  ;;  %v4512_v28 = vcombine.high %v1496_v26, %v1504_v27  ;;  %v4509_v38 = vcombine.low %v1495_v24, %v1503_v25  ;;  %v1535_v44 = vld [vmem:[%s6828_s7 + $0x350] sm:$0xff]  ;;  %v1474_v19 = vld [vmem:[%s6828_s7 + $0x168] sm:$0xff]  ;;  %v1481_v24 = vld [vmem:[%s6828_s7 + $0x1a0] sm:$0xff] }
 0x826   : > { %v1489_v25 = vld [vmem:[%s6828_s7 + $0x1e0] sm:$0xff]  ;;  %v1482_v26 = vld [vmem:[%s6828_s7 + $0x1a8] sm:$0xff] }
 0x827   : > { %2339 = vmatpush1.bf16.msra.mxu0 %v4555_v36  ;;  %v1512_v36 = vld [vmem:[%s6828_s7 + $0x298] sm:$0xff]  ;;  %v1490_v27 = vld [vmem:[%s6828_s7 + $0x1e8] sm:$0xff] }
 0x828   : > { %2296 = vmatpush1.bf16.msra.mxu1 %v4553_v35  ;;  %2410 = vmatprep.subr.bf16.mxu0 %v4448_v50  ;;  %v1519_v35 = vld [vmem:[%s6828_s7 + $0x2d0] sm:$0xff]  ;;  %v1536_v50 = vld [vmem:[%s6828_s7 + $0x358] sm:$0xff] }
 0x829   : > { %2367 = vmatprep.subr.bf16.mxu1 %v4446_v43  ;;  %v4526_v40 = vcombine.high %v1511_v34, %v1519_v35  ;;  %v1527_v43 = vld [vmem:[%s6828_s7 + $0x310] sm:$0xff] }
 0x8ae   : > { %v1400_v51 = vpop.xlane.xlu0 %1399 }
 0x8af   : > { %v1404_v52 = vmul.f32 0.0078125, %v1400_v51  ;;  %v4525_v51 = vcombine.low %v1511_v34, %v1519_v35  ;;  %v1497_v34 = vld [vmem:[%s6828_s7 + $0x220] sm:$0xff] }
 0x8b0   : > { %v1505_v35 = vld [vmem:[%s6828_s7 + $0x260] sm:$0xff] }
 0x8b1   : > { %v1406_v53 = vadd.f32 1e-05, %v1404_v52  ;;  %v4527_v52 = vcombine.low %v1512_v36, %v1520_v37 }
 0x8b2   : > { %v1403_v54 = vpop.xlane.xlu0 %1402 }
 0x8b3   : > { %5232 = vrsqrt.f32 %v1406_v53  ;;  %v1405_v56 = vmul.f32 0.0078125, %v1403_v54  ;;  %v4542_v53 = vcombine.high %v1527_v43, %v1535_v44 }
 0x8b5   : > { %v1407_v55 = vadd.f32 1e-05, %v1405_v56  ;;  %v1543_v56 = vld [vmem:[%s6828_s7 + $0x390] sm:$0xff] }
 0x8b7   : > { %5234 = vrsqrt.f32 %v1407_v55  ;;  %v1551_v55 = vld [vmem:[%s6828_s7 + $0x3d0] sm:$0xff] }
 0x8bd   : > { %v5233_v57 = vpop.eup %5232 }
 0x8be   : > { %v1410_v59 = vmul.f32 %v5233_v57, %v5673_v42  ;;  %v1455_v42 = vld [vmem:[%s6828_s7 + $0xd0] sm:$0xff]  ;;  %v1544_v57 = vld [vmem:[%s6828_s7 + $0x398] sm:$0xff] }
 0x8bf   : > { %v4462_v8 = vcombine.high %v1447_v1, %v1455_v42  ;;  %v4461_v13 = vcombine.low %v1447_v1, %v1455_v42  ;;  %v1434_v1 = vld [vmem:[%s6828_s7 + $0x28] sm:$0xff] }
 0x8c0   : > { %v1418_v61 = vmul.f32 %v4439_v4, %v1410_v59  ;;  %v1552_v59 = vld [vmem:[%s6828_s7 + $0x3d8] sm:$0xff]  ;;  %v1442_v42 = vld [vmem:[%s6828_s7 + $0x68] sm:$0xff] }
 0x8c1   : > { %v5235_v60 = vpop.eup %5234 }
 0x8c2   : > { %v1411_v62 = vmul.f32 %v5235_v60, %v5677_v49  ;;  %v1456_v49 = vld [vmem:[%s6828_s7 + $0xd8] sm:$0xff]  ;;  %v5786_v5 = vadd.f32 %v4440_v63, %v1418_v61  ;;  %v4558_v61 = vcombine.high %v1543_v56, %v1551_v55 }
 0x8c3   : > { %v4464_v9 = vcombine.high %v1448_v3, %v1456_v49  ;;  %v4463_v14 = vcombine.low %v1448_v3, %v1456_v49  ;;  %v4557_v3 = vcombine.low %v1543_v56, %v1551_v55  ;;  %v4559_v49 = vcombine.low %v1544_v57, %v1552_v59  ;;  %v1529_v56 = vld [vmem:[%s6828_s7 + $0x320] sm:$0xff] }
 0x8c4   : > { %v1419_v0 = vmul.f32 %v4439_v4, %v1411_v62  ;;  %v4541_v4 = vcombine.low %v1527_v43, %v1535_v44  ;;  %v4560_v62 = vcombine.high %v1544_v57, %v1552_v59  ;;  %v1513_v43 = vld [vmem:[%s6828_s7 + $0x2a0] sm:$0xff]  ;;  %v1530_v57 = vld [vmem:[%s6828_s7 + $0x328] sm:$0xff] }
 0x8c5   : > { %v1521_v44 = vld [vmem:[%s6828_s7 + $0x2e0] sm:$0xff]  ;;  %v1538_v59 = vld [vmem:[%s6828_s7 + $0x368] sm:$0xff] }
 0x8c6   : > { %v5788_v6 = vadd.f32 %v4440_v63, %v1419_v0  ;;  %v1433_v63 = vld [vmem:[%s6828_s7 + $0x20] sm:$0xff] }
 0x8c7   : > { %v1441_v0 = vld [vmem:[%s6828_s7 + $0x60] sm:$0xff] }
 0x8c8   : > { %v5792_v7 = vpack.c.bf16 %v5788_v6, %v5786_v5  ;;  %v1537_v55 = vld [vmem:[%s6828_s7 + $0x360] sm:$0xff] }
 0x8ca   : > { %2314 = vmatmul.mubr.bf16.vlgmr.msra.gmra.mrb[28].mxu1 %v5792_v7  ;;  %2357 = vmatmul.mubr.bf16.vlgmr.msra.gmra.mrb[16].mxu0 %v5792_v7 }
 0x8cb   : > { %2368 = vmatpush1.bf16.msra.mxu1 %v4445_v41  ;;  %2411 = vmatpush1.bf16.msra.mxu0 %v4447_v46  ;;  %v4528_v41 = vcombine.high %v1512_v36, %v1520_v37  ;;  %v1528_v46 = vld [vmem:[%s6828_s7 + $0x318] sm:$0xff]  ;;  %v1498_v36 = vld [vmem:[%s6828_s7 + $0x228] sm:$0xff] }
 0x8cc   : > { %2369 = vmatprep.subr.bf16.mxu1 %v4462_v8  ;;  %2412 = vmatprep.subr.bf16.mxu0 %v4464_v9  ;;  %v4544_v54 = vcombine.high %v1528_v46, %v1536_v50  ;;  %v4543_v60 = vcombine.low %v1528_v46, %v1536_v50  ;;  %v4450_v8 = vcombine.high %v1433_v63, %v1441_v0  ;;  %v1506_v37 = vld [vmem:[%s6828_s7 + $0x268] sm:$0xff] }
 0x8cd   : > { %2399 = vmatprep.mubr.bf16.mxu1 %v5314_v2  ;;  %2442 = vmatprep.mubr.bf16.mxu0 %v5314_v2  ;;  %v4452_v9 = vcombine.high %v1434_v1, %v1442_v42  ;;  %v1514_v46 = vld [vmem:[%s6828_s7 + $0x2a8] sm:$0xff] }
 0x8ce   : > { %v1522_v50 = vld [vmem:[%s6828_s7 + $0x2e8] sm:$0xff] }
 0x8cf   : > { %2370 = vmatpush1.bf16.msra.mxu1 %v4461_v13  ;;  %2413 = vmatpush1.bf16.msra.mxu0 %v4463_v14  ;;  %v4449_v13 = vcombine.low %v1433_v63, %v1441_v0  ;;  %v4451_v14 = vcombine.low %v1434_v1, %v1442_v42  ;;  %v1545_v63 = vld [vmem:[%s6828_s7 + $0x3a0] sm:$0xff]  ;;  %v1546_v1 = vld [vmem:[%s6828_s7 + $0x3a8] sm:$0xff] }
 0x8d0   : > { %2371 = vmatprep.subr.bf16.mxu1 %v4478_v45  ;;  %2414 = vmatprep.subr.bf16.mxu0 %v4480_v15  ;;  %v4466_v45 = vcombine.high %v1449_v10, %v1457_v11  ;;  %v4468_v15 = vcombine.high %v1450_v12, %v1458_v48  ;;  %v1553_v0 = vld [vmem:[%s6828_s7 + $0x3e0] sm:$0xff]  ;;  %v1554_v42 = vld [vmem:[%s6828_s7 + $0x3e8] sm:$0xff] }
 0x8d3   : > { %2372 = vmatpush1.bf16.msra.mxu1 %v4477_v20  ;;  %2415 = vmatpush1.bf16.msra.mxu0 %v4479_v21  ;;  %v4465_v20 = vcombine.low %v1449_v10, %v1457_v11  ;;  %v4467_v21 = vcombine.low %v1450_v12, %v1458_v48  ;;  %v1435_v10 = vld [vmem:[%s6828_s7 + $0x30] sm:$0xff]  ;;  %v1436_v12 = vld [vmem:[%s6828_s7 + $0x38] sm:$0xff] }
 0x8d4   : > { %2373 = vmatprep.subr.bf16.mxu1 %v4494_v22  ;;  %2416 = vmatprep.subr.bf16.mxu0 %v4496_v23  ;;  %v4482_v22 = vcombine.high %v1465_v16, %v1473_v17  ;;  %v4484_v23 = vcombine.high %v1466_v18, %v1474_v19  ;;  %v1443_v11 = vld [vmem:[%s6828_s7 + $0x70] sm:$0xff]  ;;  %v1444_v48 = vld [vmem:[%s6828_s7 + $0x78] sm:$0xff] }
 0x8d7   : > { %2374 = vmatpush1.bf16.msra.mxu1 %v4493_v29  ;;  %2417 = vmatpush1.bf16.msra.mxu0 %v4495_v32  ;;  %v4481_v29 = vcombine.low %v1465_v16, %v1473_v17  ;;  %v4483_v32 = vcombine.low %v1466_v18, %v1474_v19  ;;  %v1451_v16 = vld [vmem:[%s6828_s7 + $0xb0] sm:$0xff]  ;;  %v1452_v18 = vld [vmem:[%s6828_s7 + $0xb8] sm:$0xff] }
 0x8d8   : > { %2375 = vmatprep.subr.bf16.mxu1 %v4510_v58  ;;  %2418 = vmatprep.subr.bf16.mxu0 %v4512_v28  ;;  %v4498_v58 = vcombine.high %v1481_v24, %v1489_v25  ;;  %v4500_v28 = vcombine.high %v1482_v26, %v1490_v27  ;;  %v1459_v17 = vld [vmem:[%s6828_s7 + $0xf0] sm:$0xff]  ;;  %v1460_v19 = vld [vmem:[%s6828_s7 + $0xf8] sm:$0xff] }
 0x8db   : > { %2376 = vmatpush1.bf16.msra.mxu1 %v4509_v38  ;;  %2419 = vmatpush1.bf16.msra.mxu0 %v4511_v39  ;;  %v4497_v38 = vcombine.low %v1481_v24, %v1489_v25  ;;  %v4499_v39 = vcombine.low %v1482_v26, %v1490_v27  ;;  %v1467_v24 = vld [vmem:[%s6828_s7 + $0x130] sm:$0xff]  ;;  %v1468_v26 = vld [vmem:[%s6828_s7 + $0x138] sm:$0xff] }
 0x8dc   : > { %2377 = vmatprep.subr.bf16.mxu1 %v4526_v40  ;;  %2420 = vmatprep.subr.bf16.mxu0 %v4528_v41  ;;  %v4514_v40 = vcombine.high %v1497_v34, %v1505_v35  ;;  %v4516_v41 = vcombine.high %v1498_v36, %v1506_v37  ;;  %v1475_v25 = vld [vmem:[%s6828_s7 + $0x170] sm:$0xff]  ;;  %v1476_v27 = vld [vmem:[%s6828_s7 + $0x178] sm:$0xff] }
 0x8df   : > { %2378 = vmatpush1.bf16.msra.mxu1 %v4525_v51  ;;  %2421 = vmatpush1.bf16.msra.mxu0 %v4527_v52  ;;  %v4513_v51 = vcombine.low %v1497_v34, %v1505_v35  ;;  %v4515_v52 = vcombine.low %v1498_v36, %v1506_v37  ;;  %v1483_v34 = vld [vmem:[%s6828_s7 + $0x1b0] sm:$0xff]  ;;  %v1484_v36 = vld [vmem:[%s6828_s7 + $0x1b8] sm:$0xff] }
 0x8e0   : > { %2379 = vmatprep.subr.bf16.mxu1 %v4542_v53  ;;  %2422 = vmatprep.subr.bf16.mxu0 %v4544_v54  ;;  %v4530_v53 = vcombine.high %v1513_v43, %v1521_v44  ;;  %v4532_v54 = vcombine.high %v1514_v46, %v1522_v50  ;;  %v1491_v35 = vld [vmem:[%s6828_s7 + $0x1f0] sm:$0xff]  ;;  %v1492_v37 = vld [vmem:[%s6828_s7 + $0x1f8] sm:$0xff] }
 0x8e3   : > { %2380 = vmatpush1.bf16.msra.mxu1 %v4541_v4  ;;  %2423 = vmatpush1.bf16.msra.mxu0 %v4543_v60  ;;  %v4529_v4 = vcombine.low %v1513_v43, %v1521_v44  ;;  %v4531_v60 = vcombine.low %v1514_v46, %v1522_v50  ;;  %v1499_v43 = vld [vmem:[%s6828_s7 + $0x230] sm:$0xff]  ;;  %v1508_v46 = vld [vmem:[%s6828_s7 + $0x278] sm:$0xff]  ;;  %v4501_v50 = vcombine.low %v1483_v34, %v1491_v35 }
 0x8e4   : > { %2381 = vmatprep.subr.bf16.mxu1 %v4558_v61  ;;  %2424 = vmatprep.subr.bf16.mxu0 %v4560_v62  ;;  %v4546_v61 = vcombine.high %v1529_v56, %v1537_v55  ;;  %v4548_v62 = vcombine.high %v1530_v57, %v1538_v59  ;;  %v1507_v44 = vld [vmem:[%s6828_s7 + $0x270] sm:$0xff] }
 0x8e7   : > { %2382 = vmatpush1.bf16.msra.mxu1 %v4557_v3  ;;  %2425 = vmatpush1.bf16.msra.mxu0 %v4559_v49  ;;  %v4545_v3 = vcombine.low %v1529_v56, %v1537_v55  ;;  %v4547_v49 = vcombine.low %v1530_v57, %v1538_v59  ;;  %v1523_v56 = vld [vmem:[%s6828_s7 + $0x2f0] sm:$0xff]  ;;  %v1516_v55 = vld [vmem:[%s6828_s7 + $0x2b8] sm:$0xff]  ;;  %v4517_v59 = vcombine.low %v1499_v43, %v1507_v44 }
 0x8e8   : > { %2453 = vmatprep.subr.bf16.mxu1 %v4450_v8  ;;  %2496 = vmatprep.subr.bf16.mxu0 %v4452_v9  ;;  %v4562_v8 = vcombine.high %v1545_v63, %v1553_v0  ;;  %v4564_v9 = vcombine.high %v1546_v1, %v1554_v42  ;;  %v1524_v57 = vld [vmem:[%s6828_s7 + $0x2f8] sm:$0xff] }
 0x8ea   : > { %2400 = vmatmul.mubr.bf16.vlgmr.msra.gmra.mrb[32].mxu1 %v5792_v7  ;;  %2443 = vmatmul.mubr.bf16.vlgmr.msra.gmra.mrb[20].mxu0 %v5792_v7 }
 0x8eb   : > { %2454 = vmatpush1.bf16.msra.mxu1 %v4449_v13  ;;  %2497 = vmatpush1.bf16.msra.mxu0 %v4451_v14  ;;  %v4561_v13 = vcombine.low %v1545_v63, %v1553_v0  ;;  %v4563_v14 = vcombine.low %v1546_v1, %v1554_v42  ;;  %v1539_v63 = vld [vmem:[%s6828_s7 + $0x370] sm:$0xff]  ;;  %v1532_v0 = vld [vmem:[%s6828_s7 + $0x338] sm:$0xff] }
 0x8ec   : > { %2455 = vmatprep.subr.bf16.mxu1 %v4466_v45  ;;  %2498 = vmatprep.subr.bf16.mxu0 %v4468_v15  ;;  %v4454_v45 = vcombine.high %v1435_v10, %v1443_v11  ;;  %v4456_v15 = vcombine.high %v1436_v12, %v1444_v48  ;;  %v1540_v1 = vld [vmem:[%s6828_s7 + $0x378] sm:$0xff] }
 0x8ed   : > { %2485 = vmatprep.mubr.bf16.mxu1 %v5314_v2  ;;  %2528 = vmatprep.mubr.bf16.mxu0 %v5314_v2 }
 0x8ef   : > { %2456 = vmatpush1.bf16.msra.mxu1 %v4465_v20  ;;  %2499 = vmatpush1.bf16.msra.mxu0 %v4467_v21  ;;  %v4453_v20 = vcombine.low %v1435_v10, %v1443_v11  ;;  %v4455_v21 = vcombine.low %v1436_v12, %v1444_v48  ;;  %v1555_v10 = vld [vmem:[%s6828_s7 + $0x3f0] sm:$0xff]  ;;  %v1548_v11 = vld [vmem:[%s6828_s7 + $0x3b8] sm:$0xff] }
 0x8f0   : > { %2457 = vmatprep.subr.bf16.mxu1 %v4482_v22  ;;  %2500 = vmatprep.subr.bf16.mxu0 %v4484_v23  ;;  %v4470_v22 = vcombine.high %v1451_v16, %v1459_v17  ;;  %v4472_v23 = vcombine.high %v1452_v18, %v1460_v19  ;;  %v1556_v12 = vld [vmem:[%s6828_s7 + $0x3f8] sm:$0xff] }
 0x8f3   : > { %2458 = vmatpush1.bf16.msra.mxu1 %v4481_v29  ;;  %2501 = vmatpush1.bf16.msra.mxu0 %v4483_v32  ;;  %v4469_v29 = vcombine.low %v1451_v16, %v1459_v17  ;;  %v4471_v32 = vcombine.low %v1452_v18, %v1460_v19  ;;  %v4567_v16 = vcombine.low %v1548_v11, %v1556_v12  ;;  %v5072_v17 = vld [vmem:[%s6830_s9 + $0x40] sm:$0xff]  }
 0x8f4   : > { %2459 = vmatprep.subr.bf16.mxu1 %v4498_v58  ;;  %2502 = vmatprep.subr.bf16.mxu0 %v4500_v28  ;;  %v4486_v58 = vcombine.high %v1467_v24, %v1475_v25  ;;  %v4488_v28 = vcombine.high %v1468_v26, %v1476_v27  ;;  %v5073_v18 = vld [vmem:[%s6830_s9 + $0xc0] sm:$0xff]  }
 0x8f5   : > { %v5074_v19 = vld [vmem:[%s6830_s9] sm:$0xff]  }
 0x8f7   : > { %2460 = vmatpush1.bf16.msra.mxu1 %v4497_v38  ;;  %2503 = vmatpush1.bf16.msra.mxu0 %v4499_v39  ;;  %v4485_v38 = vcombine.low %v1467_v24, %v1475_v25  ;;  %v4487_v39 = vcombine.low %v1468_v26, %v1476_v27  ;;  %v5079_v24 = vld [vmem:[%s6830_s9 + $0x88] sm:$0xff]   ;;  %v5080_v25 = vld [vmem:[%s6830_s9 + $0x50] sm:$0xff]  }
 0x8f8   : > { %2461 = vmatprep.subr.bf16.mxu1 %v4514_v40  ;;  %2504 = vmatprep.subr.bf16.mxu0 %v4516_v41  ;;  %v4502_v40 = vcombine.high %v1483_v34, %v1491_v35  ;;  %v4504_v41 = vcombine.high %v1484_v36, %v1492_v37  ;;  %v5082_v26 = vld [vmem:[%s6830_s9 + $0x10] sm:$0xff]   ;;  %v5088_v34 = vld [vmem:[%s6830_s9 + $0x60] sm:$0xff]  }
 0x8f9   : > { %v5083_v27 = vld [vmem:[%s6830_s9 + $0x90] sm:$0xff]   ;;  %v5089_v35 = vld [vmem:[%s6830_s9 + $0xe0] sm:$0xff]  }
 0x8fb   : > { %2462 = vmatpush1.bf16.msra.mxu1 %v4513_v51  ;;  %2505 = vmatpush1.bf16.msra.mxu0 %v4515_v52  ;;  %v4503_v51 = vcombine.low %v1484_v36, %v1492_v37  ;;  %v4518_v52 = vcombine.high %v1499_v43, %v1507_v44  ;;  %v5090_v36 = vld [vmem:[%s6830_s9 + $0x20] sm:$0xff]   ;;  %v5096_v43 = vld [vmem:[%s6830_s9 + $0x70] sm:$0xff]  }
 0x8fc   : > { %2463 = vmatprep.subr.bf16.mxu1 %v4530_v53  ;;  %2506 = vmatprep.subr.bf16.mxu0 %v4532_v54  ;;  %v1515_v54 = vld [vmem:[%s6828_s7 + $0x2b0] sm:$0xff]  ;;  %v5091_v37 = vld [vmem:[%s6830_s9 + $0xa0] sm:$0xff]  }
 0x8fd   : > { %v4533_v42 = vcombine.low %v1515_v54, %v1523_v56  ;;  %v5097_v44 = vld [vmem:[%s6830_s9 + $0xf0] sm:$0xff]  }
 0x8ff   : > { %2464 = vmatpush1.bf16.msra.mxu1 %v4529_v4  ;;  %2507 = vmatpush1.bf16.msra.mxu0 %v4531_v60  ;;  %v4534_v60 = vcombine.high %v1515_v54, %v1523_v56  ;;  %v5104_v54 = vld [vmem:[%s6830_s9 + $0x140] sm:$0xff]  }
 0x900   : > { %2465 = vmatprep.subr.bf16.mxu1 %v4546_v61  ;;  %2508 = vmatprep.subr.bf16.mxu0 %v4548_v62  ;;  %v4536_v61 = vcombine.high %v1516_v55, %v1524_v57  ;;  %v1531_v62 = vld [vmem:[%s6828_s7 + $0x330] sm:$0xff]  ;;  %v5105_v56 = vld [vmem:[%s6830_s9 + $0x1c0] sm:$0xff]  }
 0x901   : > { %v4549_v48 = vcombine.low %v1531_v62, %v1539_v63 }
 0x903   : > { %2466 = vmatpush1.bf16.msra.mxu1 %v4545_v3  ;;  %2509 = vmatpush1.bf16.msra.mxu0 %v4547_v49  ;;  %v4535_v3 = vcombine.low %v1516_v55, %v1524_v57  ;;  %v4550_v49 = vcombine.high %v1531_v62, %v1539_v63  ;;  %v6177_v55 = vld [vmem:[%s6829_s8] sm:$0xff]  ;;  %v1575_v57 = vsub.s32 3, %v5500_v30 }
 0x904   : > { %2467 = vmatprep.subr.bf16.mxu1 %v4562_v8  ;;  %2510 = vmatprep.subr.bf16.mxu0 %v4564_v9  ;;  %v4552_v8 = vcombine.high %v1532_v0, %v1540_v1  ;;  %v1547_v9 = vld [vmem:[%s6828_s7 + $0x3b0] sm:$0xff] }
 0x907   : > { %2468 = vmatpush1.bf16.msra.mxu1 %v4561_v13  ;;  %2511 = vmatpush1.bf16.msra.mxu0 %v4563_v14  ;;  %v4551_v13 = vcombine.low %v1532_v0, %v1540_v1  ;;  %v4566_v14 = vcombine.high %v1547_v9, %v1555_v10 }
 0x908   : > { %2539 = vmatprep.subr.bf16.mxu1 %v4454_v45  ;;  %2582 = vmatprep.subr.bf16.mxu0 %v4456_v15  ;;  %v4568_v45 = vcombine.high %v1548_v11, %v1556_v12  ;;  %v4565_v15 = vcombine.low %v1547_v9, %v1555_v10 }
 0x90a   : > { %2486 = vmatmul.mubr.bf16.vlgmr.msra.gmra.mrb[36].mxu1 %v5792_v7  ;;  %2529 = vmatmul.mubr.bf16.vlgmr.msra.gmra.mrb[24].mxu0 %v5792_v7 }
 0x90b   : > { %2540 = vmatpush1.bf16.msra.mxu1 %v4453_v20  ;;  %2583 = vmatpush1.bf16.msra.mxu0 %v4455_v21  ;;  %v5075_v20 = vld [vmem:[%s6830_s9 + $0x80] sm:$0xff]   ;;  %v5076_v21 = vld [vmem:[%s6830_s9 + $0x48] sm:$0xff]  }
 0x90c   : > { %2541 = vmatprep.subr.bf16.mxu1 %v4470_v22  ;;  %2584 = vmatprep.subr.bf16.mxu0 %v4472_v23  ;;  %v5077_v22 = vld [vmem:[%s6830_s9 + $0xc8] sm:$0xff]  }
 0x90d   : > { %2571 = vmatprep.mubr.bf16.mxu1 %v5314_v2  ;;  %2614 = vmatprep.mubr.bf16.mxu0 %v5314_v2  ;;  %v1500_v2 = vld [vmem:[%s6828_s7 + $0x238] sm:$0xff]  ;;  %v5078_v23 = vld [vmem:[%s6830_s9 + $0x8] sm:$0xff]  }
 0x90e   : > { %v4520_v53 = vcombine.high %v1500_v2, %v1508_v46  ;;  %v4519_v4 = vcombine.low %v1500_v2, %v1508_v46  ;;  %v5098_v2 = vld [vmem:[%s6830_s9 + $0x30] sm:$0xff]  }
 0x90f   : > { %2542 = vmatpush1.bf16.msra.mxu1 %v4469_v29  ;;  %2585 = vmatpush1.bf16.msra.mxu0 %v4471_v32  ;;  %v5084_v29 = vld [vmem:[%s6830_s9 + $0x58] sm:$0xff]   ;;  %v5099_v46 = vld [vmem:[%s6830_s9 + $0xb0] sm:$0xff]  }
 0x910   : > { %2543 = vmatprep.subr.bf16.mxu1 %v4486_v58  ;;  %2586 = vmatprep.subr.bf16.mxu0 %v4488_v28  ;;  %v5085_v32 = vld [vmem:[%s6830_s9 + $0xd8] sm:$0xff]  }
 0x911   : > { %v5086_v58 = vld [vmem:[%s6830_s9 + $0x18] sm:$0xff]  }
 0x912   : > { %v5087_v28 = vld [vmem:[%s6830_s9 + $0x98] sm:$0xff]  }
 0x913   : > { %2544 = vmatpush1.bf16.msra.mxu1 %v4485_v38  ;;  %2587 = vmatpush1.bf16.msra.mxu0 %v4487_v39  ;;  %v5092_v38 = vld [vmem:[%s6830_s9 + $0x68] sm:$0xff]  }
 0x914   : > { %2545 = vmatprep.subr.bf16.mxu1 %v4502_v40  ;;  %2588 = vmatprep.subr.bf16.mxu0 %v4504_v41  ;;  %v5093_v39 = vld [vmem:[%s6830_s9 + $0xe8] sm:$0xff]  }
 0x915   : > { %v5094_v40 = vld [vmem:[%s6830_s9 + $0x28] sm:$0xff]  }
 0x916   : > { %v5095_v41 = vld [vmem:[%s6830_s9 + $0xa8] sm:$0xff]  }
 0x917   : > { %2546 = vmatpush1.bf16.msra.mxu1 %v4501_v50  ;;  %2589 = vmatpush1.bf16.msra.mxu0 %v4503_v51  ;;  %v5100_v50 = vld [vmem:[%s6830_s9 + $0x78] sm:$0xff]  }
 0x918   : > { %2547 = vmatprep.subr.bf16.mxu1 %v4518_v52  ;;  %2590 = vmatprep.subr.bf16.mxu0 %v4520_v53  ;;  %v5101_v51 = vld [vmem:[%s6830_s9 + $0xf8] sm:$0xff]  }
 0x919   : > { %v5102_v52 = vld [vmem:[%s6830_s9 + $0x38] sm:$0xff]  }
 0x91a   : > { %v5103_v53 = vld [vmem:[%s6830_s9 + $0xb8] sm:$0xff]  }
 0x91b   : > { %2548 = vmatpush1.bf16.msra.mxu1 %v4517_v59  ;;  %2591 = vmatpush1.bf16.msra.mxu0 %v4519_v4  ;;  %v1564_v59 = vrot.slane %v6177_v55, %v5503_v31  ;;  %v1572_v4 = vrot.slane %v6177_v55, %v5519_v47 }
 0x91c   : > { %2549 = vmatprep.subr.bf16.mxu1 %v4534_v60  ;;  %2592 = vmatprep.subr.bf16.mxu0 %v4536_v61  ;;  %v1568_v60 = vrot.slane %v6177_v55, %v5509_v33  ;;  %v1576_v61 = vrot.slane %v6177_v55, %v1575_v57 }
 0x91f   : > { %2550 = vmatpush1.bf16.msra.mxu1 %v4533_v42  ;;  %2593 = vmatpush1.bf16.msra.mxu0 %v4535_v3 }
 0x920   : > { %2551 = vmatprep.subr.bf16.mxu1 %v4550_v49  ;;  %2594 = vmatprep.subr.bf16.mxu0 %v4552_v8 }
 0x923   : > { %2552 = vmatpush1.bf16.msra.mxu1 %v4549_v48  ;;  %2595 = vmatpush1.bf16.msra.mxu0 %v4551_v13 }
 0x924   : > { %2553 = vmatprep.subr.bf16.mxu1 %v4566_v14  ;;  %2596 = vmatprep.subr.bf16.mxu0 %v4568_v45 }
 0x927   : > { %2554 = vmatpush1.bf16.msra.mxu1 %v4565_v15  ;;  %2597 = vmatpush1.bf16.msra.mxu0 %v4567_v16 }
 0x928   : > { %4738 = vmatprep.subr.bf16.mxu1 %v5072_v17  ;;  %4760 = vmatprep.subr.bf16.mxu0 %v5073_v18 }
 0x92a   : > { %2572 = vmatmul.mubr.bf16.vlgmr.msra.gmra.mrb[40].mxu1 %v5792_v7  ;;  %2615 = vmatmul.mubr.bf16.vlgmr.msra.gmra.mrb[28].mxu0 %v5792_v7  ;;  %v5081_v7 = vld [vmem:[%s6830_s9 + $0xd0] sm:$0xff]  }
 0x92b   : > { %4739 = vmatpush3.bf16.msra.mxu1 %v5074_v19  ;;  %4761 = vmatpush3.bf16.msra.mxu0 %v5075_v20 }
 0x92c   : > { %4740 = vmatprep.subr.bf16.mxu1 %v5076_v21  ;;  %4762 = vmatprep.subr.bf16.mxu0 %v5077_v22 }
 0x92f   : > { %4741 = vmatpush3.bf16.msra.mxu1 %v5078_v23  ;;  %4763 = vmatpush3.bf16.msra.mxu0 %v5079_v24 }
 0x930   : > { %4742 = vmatprep.subr.bf16.mxu1 %v5080_v25  ;;  %4764 = vmatprep.subr.bf16.mxu0 %v5081_v7 }
 0x933   : > { %4743 = vmatpush3.bf16.msra.mxu1 %v5082_v26  ;;  %4765 = vmatpush3.bf16.msra.mxu0 %v5083_v27 }
 0x934   : > { %4744 = vmatprep.subr.bf16.mxu1 %v5084_v29  ;;  %4766 = vmatprep.subr.bf16.mxu0 %v5085_v32 }
 0x937   : > { %4745 = vmatpush3.bf16.msra.mxu1 %v5086_v58  ;;  %4767 = vmatpush3.bf16.msra.mxu0 %v5087_v28 }
 0x938   : > { %4746 = vmatprep.subr.bf16.mxu1 %v5088_v34  ;;  %4768 = vmatprep.subr.bf16.mxu0 %v5089_v35 }
 0x93b   : > { %4747 = vmatpush3.bf16.msra.mxu1 %v5090_v36  ;;  %4769 = vmatpush3.bf16.msra.mxu0 %v5091_v37 }
 0x93c   : > { %4748 = vmatprep.subr.bf16.mxu1 %v5092_v38  ;;  %4770 = vmatprep.subr.bf16.mxu0 %v5093_v39 }
 0x93f   : > { %4749 = vmatpush3.bf16.msra.mxu1 %v5094_v40  ;;  %4771 = vmatpush3.bf16.msra.mxu0 %v5095_v41 }
 0x940   : > { %4750 = vmatprep.subr.bf16.mxu1 %v5096_v43  ;;  %4772 = vmatprep.subr.bf16.mxu0 %v5097_v44 }
 0x943   : > { %4751 = vmatpush3.bf16.msra.mxu1 %v5098_v2  ;;  %4773 = vmatpush3.bf16.msra.mxu0 %v5099_v46 }
 0x944   : > { %4752 = vmatprep.subr.bf16.mxu1 %v5100_v50  ;;  %4774 = vmatprep.subr.bf16.mxu0 %v5101_v51 }
 0x947   : > { %4753 = vmatpush3.bf16.msra.mxu1 %v5102_v52  ;;  %4775 = vmatpush3.bf16.msra.mxu0 %v5103_v53 }
 0x948   : > { %4782 = vmatprep.subr.bf16.mxu1 %v5104_v54  ;;  %4804 = vmatprep.subr.bf16.mxu0 %v5105_v56 }
 0x99d   : > { %v2315_v62 = vpop.f32.mrb[28].mxu1  ;;  %v2358_v63 = vpop.f32.mrb[16].mxu0 }
 0x99e   : > { %v6189_v0 = vadd.f32 %v2315_v62, %v1564_v59  ;;  %v6191_v1 = vadd.f32 %v2358_v63, %v1572_v4  ;;  %v2317_v42 = vpop.f32.mrb[29].mxu1  ;;  %v2360_v3 = vpop.f32.mrb[17].mxu0 }
 0x99f   : > { %v6193_v49 = vadd.f32 %v2317_v42, %v1568_v60  ;;  %v6195_v8 = vadd.f32 %v2360_v3, %v1576_v61  ;;  %v2319_v9 = vpop.f32.mrb[30].mxu1  ;;  %v2362_v10 = vpop.f32.mrb[18].mxu0 }
 0x9a0   : > { %v2625_v11 = vmul.f32 %v6189_v0, %v6189_v0  ;;  %v2627_v12 = vmul.f32 %v6191_v1, %v6191_v1  ;;  %v6201_v48 = vadd.f32 %v2319_v9, %v1564_v59  ;;  %v6203_v13 = vadd.f32 %v2362_v10, %v1572_v4  ;;  %v2321_v14 = vpop.f32.mrb[31].mxu1  ;;  %v2364_v45 = vpop.f32.mrb[19].mxu0 }
 0x9a1   : > { %v2626_v15 = vmul.f32 %v6193_v49, %v6193_v49  ;;  %v2628_v16 = vmul.f32 %v6195_v8, %v6195_v8  ;;  %v6209_v17 = vadd.f32 %v2321_v14, %v1568_v60  ;;  %v6211_v18 = vadd.f32 %v2364_v45, %v1576_v61 }
 0x9a2   : > { %v2657_v19 = vmul.f32 %v2625_v11, %v6189_v0  ;;  %v2659_v20 = vmul.f32 %v2627_v12, %v6191_v1  ;;  %v2641_v21 = vmul.f32 %v6201_v48, %v6201_v48  ;;  %v2643_v22 = vmul.f32 %v6203_v13, %v6203_v13 }
 0x9a3   : > { %v2658_v23 = vmul.f32 %v2626_v15, %v6193_v49  ;;  %v2660_v24 = vmul.f32 %v2628_v16, %v6195_v8  ;;  %v2642_v25 = vmul.f32 %v6209_v17, %v6209_v17  ;;  %v2644_v7 = vmul.f32 %v6211_v18, %v6211_v18 }
 0x9a4   : > { %v2689_v26 = vmul.f32 0.044715, %v2657_v19  ;;  %v2691_v27 = vmul.f32 0.044715, %v2659_v20  ;;  %v2673_v29 = vmul.f32 %v2641_v21, %v6201_v48  ;;  %v2675_v32 = vmul.f32 %v2643_v22, %v6203_v13 }
 0x9a5   : > { %v2690_v58 = vmul.f32 0.044715, %v2658_v23  ;;  %v2692_v28 = vmul.f32 0.044715, %v2660_v24  ;;  %v2674_v34 = vmul.f32 %v2642_v25, %v6209_v17  ;;  %v2676_v35 = vmul.f32 %v2644_v7, %v6211_v18 }
 0x9a6   : > { %v2721_v36 = vadd.f32 %v2689_v26, %v6189_v0  ;;  %v2723_v37 = vadd.f32 %v2691_v27, %v6191_v1  ;;  %v2705_v38 = vmul.f32 0.044715, %v2673_v29  ;;  %v2707_v39 = vmul.f32 0.044715, %v2675_v32 }
 0x9a7   : > { %v2722_v40 = vadd.f32 %v2690_v58, %v6193_v49  ;;  %v2724_v41 = vadd.f32 %v2692_v28, %v6195_v8  ;;  %v2706_v43 = vmul.f32 0.044715, %v2674_v34  ;;  %v2708_v44 = vmul.f32 0.044715, %v2676_v35 }
 0x9a8   : > { %v2753_v2 = vmul.f32 0.7978846, %v2721_v36  ;;  %v2755_v46 = vmul.f32 0.7978846, %v2723_v37  ;;  %v2737_v50 = vadd.f32 %v2705_v38, %v6201_v48  ;;  %v2739_v51 = vadd.f32 %v2707_v39, %v6203_v13 }
 0x9a9   : > { %v2754_v52 = vmul.f32 0.7978846, %v2722_v40  ;;  %v2756_v53 = vmul.f32 0.7978846, %v2724_v41  ;;  %v2738_v54 = vadd.f32 %v2706_v43, %v6209_v17  ;;  %v2740_v56 = vadd.f32 %v2708_v44, %v6211_v18 }
 0x9aa   : > { %5236 = vtanh.f32 %v2753_v2  ;;  %v2769_v59 = vmul.f32 0.7978846, %v2737_v50  ;;  %v2771_v4 = vmul.f32 0.7978846, %v2739_v51  ;;  %v1579_v9 = vsub.s32 4, %v5500_v30 }
 0x9ab   : > { %5238 = vtanh.f32 %v2755_v46  ;;  %v2770_v60 = vmul.f32 0.7978846, %v2738_v54  ;;  %v2772_v61 = vmul.f32 0.7978846, %v2740_v56  ;;  %v1587_v10 = vsub.s32 6, %v5500_v30 }
 0x9ac   : > { %5240 = vtanh.f32 %v2754_v52  ;;  %v1583_v12 = vsub.s32 5, %v5500_v30  ;;  %v1591_v14 = vsub.s32 7, %v5500_v30  ;;  %v1580_v7 = vrot.slane %v6177_v55, %v1579_v9 }
 0x9ad   : > { %5242 = vtanh.f32 %v2756_v53  ;;  %v1588_v26 = vrot.slane %v6177_v55, %v1587_v10 }
 0x9ae   : > { %5244 = vtanh.f32 %v2769_v59  ;;  %v1584_v32 = vrot.slane %v6177_v55, %v1583_v12  ;;  %v1592_v58 = vrot.slane %v6177_v55, %v1591_v14 }
 0x9af   : > { %5246 = vtanh.f32 %v2771_v4 }
 0x9b0   : > { %5248 = vtanh.f32 %v2770_v60 }
 0x9b1   : > { %5250 = vtanh.f32 %v2772_v61 }
 0x9b4   : > { %v5237_v62 = vpop.eup %5236 }
 0x9b5   : > { %v5239_v63 = vpop.eup %5238  ;;  %v2817_v42 = vadd.f32 1.0, %v5237_v62 }
 0x9b6   : > { %v5241_v3 = vpop.eup %5240  ;;  %v2819_v19 = vadd.f32 1.0, %v5239_v63 }
 0x9b7   : > { %v5243_v11 = vpop.eup %5242  ;;  %v2818_v45 = vadd.f32 1.0, %v5241_v3  ;;  %v2849_v16 = vmul.f32 0.5, %v2817_v42 }
 0x9b8   : > { %v5245_v15 = vpop.eup %5244  ;;  %v2820_v23 = vadd.f32 1.0, %v5243_v11  ;;  %v6256_v35 = vmul.f32 0.5, %v2819_v19 }
 0x9b9   : > { %v5247_v20 = vpop.eup %5246  ;;  %v2833_v21 = vadd.f32 1.0, %v5245_v15  ;;  %v2850_v22 = vmul.f32 0.5, %v2818_v45  ;;  %v6254_v34 = vmul.f32 %v2849_v16, %v6189_v0 }
 0x9ba   : > { %v5249_v24 = vpop.eup %5248  ;;  %v2835_v25 = vadd.f32 1.0, %v5247_v20  ;;  %v2852_v44 = vmul.f32 0.5, %v2820_v23 }
 0x9bb   : > { %v5251_v27 = vpop.eup %5250  ;;  %v2865_v29 = vmul.f32 0.5, %v2833_v21  ;;  %v2834_v28 = vadd.f32 1.0, %v5249_v24  ;;  %v6262_v43 = vmul.f32 %v2850_v22, %v6193_v49 }
 0x9bc   : > { %v2867_v36 = vmul.f32 0.5, %v2835_v25  ;;  %v2836_v37 = vadd.f32 1.0, %v5251_v27 }
 0x9bd   : > { %v6259_v38 = vmul.f32 %v2865_v29, %v6201_v48  ;;  %v2401_v39 = vpop.f32.mrb[32].mxu1  ;;  %v2444_v40 = vpop.f32.mrb[20].mxu0  ;;  %v2866_v41 = vmul.f32 0.5, %v2834_v28 }
 0x9be   : > { %v6265_v55 = vmul.f32 %v2867_v36, %v6203_v13  ;;  %v6267_v2 = vadd.f32 %v2401_v39, %v1580_v7  ;;  %v6269_v0 = vadd.f32 %v2444_v40, %v1588_v26  ;;  %v2403_v46 = vpop.f32.mrb[33].mxu1  ;;  %v2446_v50 = vpop.f32.mrb[21].mxu0  ;;  %v2868_v51 = vmul.f32 0.5, %v2836_v37 }
 0x9bf   : > { %v6271_v52 = vadd.f32 %v2403_v46, %v1584_v32  ;;  %v6273_v48 = vadd.f32 %v2446_v50, %v1592_v58  ;;  %v2405_v53 = vpop.f32.mrb[34].mxu1  ;;  %v2448_v54 = vpop.f32.mrb[22].mxu0  ;;  %v2898_v49 = vmul.f32 %v2866_v41, %v6209_v17  ;;  %v2913_v56 = vpack.c.bf16 %v6259_v38, %v6254_v34 }
 0x9c0   : > { %v2629_v13 = vmul.f32 %v6267_v2, %v6267_v2  ;;  %v2631_v59 = vmul.f32 %v6269_v0, %v6269_v0  ;;  %v6282_v4 = vadd.f32 %v2405_v53, %v1580_v7  ;;  %v6284_v60 = vadd.f32 %v2448_v54, %v1588_v26  ;;  %v2407_v61 = vpop.f32.mrb[35].mxu1  ;;  %v2450_v62 = vpop.f32.mrb[23].mxu0 }
 0x9c1   : > { %v2630_v63 = vmul.f32 %v6271_v52, %v6271_v52  ;;  %v2632_v17 = vmul.f32 %v6273_v48, %v6273_v48  ;;  %v6290_v42 = vadd.f32 %v2407_v61, %v1584_v32  ;;  %v6292_v3 = vadd.f32 %v2450_v62, %v1592_v58 }
 0x9c2   : > { %v2661_v11 = vmul.f32 %v2629_v13, %v6267_v2  ;;  %v2663_v45 = vmul.f32 %v2631_v59, %v6269_v0  ;;  %v2645_v15 = vmul.f32 %v6282_v4, %v6282_v4  ;;  %v2647_v16 = vmul.f32 %v6284_v60, %v6284_v60 }
 0x9c3   : > { %v2662_v19 = vmul.f32 %v2630_v63, %v6271_v52  ;;  %v2664_v20 = vmul.f32 %v2632_v17, %v6273_v48  ;;  %v2646_v21 = vmul.f32 %v6290_v42, %v6290_v42  ;;  %v2648_v22 = vmul.f32 %v6292_v3, %v6292_v3 }
 0x9c4   : > { %v2693_v23 = vmul.f32 0.044715, %v2661_v11  ;;  %v2695_v24 = vmul.f32 0.044715, %v2663_v45  ;;  %v2677_v25 = vmul.f32 %v2645_v15, %v6282_v4  ;;  %v2679_v7 = vmul.f32 %v2647_v16, %v6284_v60  ;;  %v5106_v11 = vld [vmem:[%s6830_s9 + $0x100] sm:$0xff]  }
 0x9c5   : > { %v2694_v26 = vmul.f32 0.044715, %v2662_v19  ;;  %v2696_v27 = vmul.f32 0.044715, %v2664_v20  ;;  %v2678_v29 = vmul.f32 %v2646_v21, %v6290_v42  ;;  %v2680_v32 = vmul.f32 %v2648_v22, %v6292_v3  ;;  %v5108_v19 = vld [vmem:[%s6830_s9 + $0x148] sm:$0xff]   ;;  %v5107_v20 = vld [vmem:[%s6830_s9 + $0x180] sm:$0xff]  }
 0x9c6   : > { %v2725_v58 = vadd.f32 %v2693_v23, %v6267_v2  ;;  %v2727_v28 = vadd.f32 %v2695_v24, %v6269_v0  ;;  %v2709_v34 = vmul.f32 0.044715, %v2677_v25  ;;  %v2711_v36 = vmul.f32 0.044715, %v2679_v7  ;;  %v5116_v21 = vld [vmem:[%s6830_s9 + $0x158] sm:$0xff]   ;;  %v5115_v25 = vld [vmem:[%s6830_s9 + $0x190] sm:$0xff]  }
 0x9c7   : > { %v2726_v37 = vadd.f32 %v2694_v26, %v6271_v52  ;;  %v2728_v38 = vadd.f32 %v2696_v27, %v6273_v48  ;;  %v2710_v39 = vmul.f32 0.044715, %v2678_v29  ;;  %v2712_v40 = vmul.f32 0.044715, %v2680_v32  ;;  %v5117_v27 = vld [vmem:[%s6830_s9 + $0x1d8] sm:$0xff]  }
 0x9c8   : > { %v2757_v41 = vmul.f32 0.7978846, %v2725_v58  ;;  %v2759_v46 = vmul.f32 0.7978846, %v2727_v28  ;;  %v2741_v50 = vadd.f32 %v2709_v34, %v6282_v4  ;;  %v2743_v53 = vadd.f32 %v2711_v36, %v6284_v60  ;;  %v5118_v29 = vld [vmem:[%s6830_s9 + $0x118] sm:$0xff]   ;;  %v5120_v58 = vld [vmem:[%s6830_s9 + $0x160] sm:$0xff]  }
 0x9c9   : > { %v2758_v54 = vmul.f32 0.7978846, %v2726_v37  ;;  %v2760_v13 = vmul.f32 0.7978846, %v2728_v38  ;;  %v2742_v59 = vadd.f32 %v2710_v39, %v6290_v42  ;;  %v2744_v61 = vadd.f32 %v2712_v40, %v6292_v3  ;;  %v6369_v28 = vld [vmem:[%s6829_s8 + $0x8] sm:$0xff] }
 0x9ca   : > { %v2883_v62 = vmul.f32 %v6256_v35, %v6191_v1  ;;  %5252 = vtanh.f32 %v2757_v41  ;;  %v2773_v63 = vmul.f32 0.7978846, %v2741_v50  ;;  %v2914_v17 = vpack.c.bf16 %v2898_v49, %v6262_v43  ;;  %v5119_v41 = vld [vmem:[%s6830_s9 + $0x198] sm:$0xff]  }
 0x9cb   : > { %5254 = vtanh.f32 %v2759_v46  ;;  %v2775_v45 = vmul.f32 0.7978846, %v2743_v53  ;;  %v2884_v15 = vmul.f32 %v2852_v44, %v6195_v8  ;;  %v2900_v16 = vmul.f32 %v2868_v51, %v6211_v18  ;;  %v5109_v8 = vld [vmem:[%s6830_s9 + $0x1c8] sm:$0xff]   ;;  %v5112_v44 = vld [vmem:[%s6830_s9 + $0x150] sm:$0xff]  }
 0x9cc   : > { %5256 = vtanh.f32 %v2758_v54  ;;  %v2774_v1 = vmul.f32 0.7978846, %v2742_v59  ;;  %3992 = vmatprep.mubr.bf16.mxu1 %v2914_v17  ;;  %v2915_v35 = vpack.c.bf16 %v6265_v55, %v2883_v62  ;;  %v2776_v43 = vmul.f32 0.7978846, %v2744_v61  ;;  %v5110_v18 = vld [vmem:[%s6830_s9 + $0x108] sm:$0xff]   ;;  %v5113_v51 = vld [vmem:[%s6830_s9 + $0x1d0] sm:$0xff]  }
 0x9cd   : > { %5258 = vtanh.f32 %v2760_v13  ;;  %v2916_v49 = vpack.c.bf16 %v2900_v16, %v2884_v15  ;;  %3993 = vmatmul.mubr.bf16.vlgmr.msra.gmra.mrb[44].mxu1 %v2913_v56  ;;  %v5111_v55 = vld [vmem:[%s6830_s9 + $0x188] sm:$0xff]   ;;  %v5114_v56 = vld [vmem:[%s6830_s9 + $0x110] sm:$0xff]   ;;  %v5121_v13 = vld [vmem:[%s6830_s9 + $0x1e0] sm:$0xff]   ;;  %v1596_v61 = vrot.slane %v6369_v28, %v5503_v31  ;;  %v1604_v62 = vrot.slane %v6369_v28, %v5519_v47 }
 0x9ce   : > { %5260 = vtanh.f32 %v2773_v63  ;;  %4783 = vmatpush3.bf16.msra.mxu1 %v5106_v11  ;;  %v5122_v59 = vld [vmem:[%s6830_s9 + $0x120] sm:$0xff]   ;;  %v5124_v11 = vld [vmem:[%s6830_s9 + $0x168] sm:$0xff]   ;;  %v1608_v15 = vrot.slane %v6369_v28, %v1575_v57 }
 0x9cf   : > { %5262 = vtanh.f32 %v2775_v45  ;;  %4033 = vmatprep.mubr.bf16.mxu0 %v2916_v49  ;;  %4784 = vmatprep.subr.bf16.mxu1 %v5108_v19  ;;  %v1600_v45 = vrot.slane %v6369_v28, %v5509_v33  ;;  %v5123_v33 = vld [vmem:[%s6830_s9 + $0x1a0] sm:$0xff]  }
 0x9d0   : > { %5264 = vtanh.f32 %v2774_v1  ;;  %4034 = vmatmul.mubr.bf16.vlgmr.msra.gmra.mrb[32].mxu0 %v2915_v35 }
 0x9d1   : > { %5266 = vtanh.f32 %v2776_v43  ;;  %4805 = vmatpush3.bf16.msra.mxu0 %v5107_v20  ;;  %v5126_v20 = vld [vmem:[%s6830_s9 + $0x128] sm:$0xff]  }
 0x9d2   : > { %4806 = vmatprep.subr.bf16.mxu0 %v5109_v8  ;;  %4785 = vmatpush3.bf16.msra.mxu1 %v5110_v18 }
 0x9d3   : > { %4786 = vmatprep.subr.bf16.mxu1 %v5112_v44 }
 0x9d4   : > { %v5253_v22 = vpop.eup %5252 }
 0x9d5   : > { %v5255_v23 = vpop.eup %5254  ;;  %v2821_v24 = vadd.f32 1.0, %v5253_v22  ;;  %4807 = vmatpush3.bf16.msra.mxu0 %v5111_v55 }
 0x9d6   : > { %v5257_v7 = vpop.eup %5256  ;;  %v2823_v26 = vadd.f32 1.0, %v5255_v23  ;;  %4808 = vmatprep.subr.bf16.mxu0 %v5113_v51  ;;  %4787 = vmatpush3.bf16.msra.mxu1 %v5114_v56 }
 0x9d7   : > { %v5259_v32 = vpop.eup %5258  ;;  %4788 = vmatprep.subr.bf16.mxu1 %v5116_v21  ;;  %v2822_v34 = vadd.f32 1.0, %v5257_v7  ;;  %v2853_v37 = vmul.f32 0.5, %v2821_v24 }
 0x9d8   : > { %v5261_v36 = vpop.eup %5260  ;;  %v2855_v38 = vmul.f32 0.5, %v2823_v26  ;;  %v2824_v50 = vadd.f32 1.0, %v5259_v32 }
 0x9d9   : > { %v5263_v39 = vpop.eup %5262  ;;  %v2837_v40 = vadd.f32 1.0, %v5261_v36  ;;  %4809 = vmatpush3.bf16.msra.mxu0 %v5115_v25  ;;  %v2854_v46 = vmul.f32 0.5, %v2822_v34  ;;  %v6393_v31 = vmul.f32 %v2853_v37, %v6267_v2 }
 0x9da   : > { %v5265_v53 = vpop.eup %5264  ;;  %v2839_v54 = vadd.f32 1.0, %v5263_v39  ;;  %4810 = vmatprep.subr.bf16.mxu0 %v5117_v27  ;;  %4789 = vmatpush3.bf16.msra.mxu1 %v5118_v29  ;;  %v6396_v47 = vmul.f32 %v2855_v38, %v6269_v0  ;;  %v6407_v2 = vmul.f32 0.5, %v2824_v50  ;;  %v5129_v38 = vld [vmem:[%s6830_s9 + $0x1f0] sm:$0xff]  }
 0x9db   : > { %v5267_v63 = vpop.eup %5266  ;;  %v2869_v17 = vmul.f32 0.5, %v2837_v40  ;;  %4790 = vmatprep.subr.bf16.mxu1 %v5120_v58  ;;  %v2838_v16 = vadd.f32 1.0, %v5265_v53  ;;  %v6405_v57 = vmul.f32 %v2854_v46, %v6271_v52  ;;  %v5130_v39 = vld [vmem:[%s6830_s9 + $0x130] sm:$0xff]   ;;  %v5132_v53 = vld [vmem:[%s6830_s9 + $0x178] sm:$0xff]  }
 0x9dc   : > { %v2871_v19 = vmul.f32 0.5, %v2839_v54  ;;  %v2840_v55 = vadd.f32 1.0, %v5267_v63 }
 0x9dd   : > { %v6399_v1 = vmul.f32 %v2869_v17, %v6282_v4  ;;  %4811 = vmatpush3.bf16.msra.mxu0 %v5119_v41  ;;  %v2487_v35 = vpop.f32.mrb[36].mxu1  ;;  %v2530_v43 = vpop.f32.mrb[24].mxu0  ;;  %v2870_v49 = vmul.f32 0.5, %v2838_v16  ;;  %v5125_v4 = vld [vmem:[%s6830_s9 + $0x1e8] sm:$0xff]  }
 0x9de   : > { %v6410_v0 = vmul.f32 %v2871_v19, %v6284_v60  ;;  %4812 = vmatprep.subr.bf16.mxu0 %v5121_v13  ;;  %4791 = vmatpush3.bf16.msra.mxu1 %v5122_v59  ;;  %v6418_v8 = vadd.f32 %v2487_v35, %v1596_v61  ;;  %v6420_v18 = vadd.f32 %v2530_v43, %v1604_v62  ;;  %v2489_v52 = vpop.f32.mrb[37].mxu1  ;;  %v2532_v44 = vpop.f32.mrb[25].mxu0  ;;  %v5128_v60 = vld [vmem:[%s6830_s9 + $0x170] sm:$0xff]   ;;  %v2872_v50 = vmul.f32 0.5, %v2840_v55 }
 0x9df   : > { %4792 = vmatprep.subr.bf16.mxu1 %v5124_v11  ;;  %v6425_v51 = vadd.f32 %v2489_v52, %v1600_v45  ;;  %v6427_v56 = vadd.f32 %v2532_v44, %v1608_v15  ;;  %v2491_v21 = vpop.f32.mrb[38].mxu1  ;;  %v2534_v22 = vpop.f32.mrb[26].mxu0  ;;  %v6430_v23 = vmul.f32 %v2870_v49, %v6290_v42  ;;  %v2917_v24 = vpack.c.bf16 %v6399_v1, %v6393_v31  ;;  %v5127_v42 = vld [vmem:[%s6830_s9 + $0x1a8] sm:$0xff]   ;;  %v5133_v49 = vld [vmem:[%s6830_s9 + $0x1f8] sm:$0xff]   ;;  %v5144_v31 = vld [vmem:[%s6830_s9 + $0x250] sm:$0xff]  }
 0x9e0   : > { %v2633_v25 = vmul.f32 %v6418_v8, %v6418_v8  ;;  %v2635_v7 = vmul.f32 %v6420_v18, %v6420_v18  ;;  %v6438_v26 = vadd.f32 %v2491_v21, %v1596_v61  ;;  %v6440_v27 = vadd.f32 %v2534_v22, %v1604_v62  ;;  %v2493_v29 = vpop.f32.mrb[39].mxu1  ;;  %v2536_v32 = vpop.f32.mrb[27].mxu0  ;;  %v5136_v22 = vld [vmem:[%s6830_s9 + $0x240] sm:$0xff]   ;;  %v5143_v1 = vld [vmem:[%s6830_s9 + $0x288] sm:$0xff]  }
 0x9e1   : > { %4813 = vmatpush3.bf16.msra.mxu0 %v5123_v33  ;;  %v2634_v58 = vmul.f32 %v6425_v51, %v6425_v51  ;;  %v2636_v34 = vmul.f32 %v6427_v56, %v6427_v56  ;;  %v6449_v36 = vadd.f32 %v2493_v29, %v1600_v45  ;;  %v6451_v37 = vadd.f32 %v2536_v32, %v1608_v15  ;;  %v5131_v45 = vld [vmem:[%s6830_s9 + $0x1b0] sm:$0xff]  }
 0x9e2   : > { %4814 = vmatprep.subr.bf16.mxu0 %v5125_v4  ;;  %4793 = vmatpush3.bf16.msra.mxu1 %v5126_v20  ;;  %v2665_v40 = vmul.f32 %v2633_v25, %v6418_v8  ;;  %v2667_v41 = vmul.f32 %v2635_v7, %v6420_v18  ;;  %v2649_v46 = vmul.f32 %v6438_v26, %v6438_v26  ;;  %v5134_v4 = vld [vmem:[%s6830_s9 + $0x138] sm:$0xff]  }
 0x9e3   : > { %4794 = vmatprep.subr.bf16.mxu1 %v5128_v60  ;;  %v2666_v54 = vmul.f32 %v2634_v58, %v6425_v51  ;;  %v2668_v13 = vmul.f32 %v2636_v34, %v6427_v56  ;;  %v2651_v59 = vmul.f32 %v6440_v27, %v6440_v27  ;;  %v2650_v61 = vmul.f32 %v6449_v36, %v6449_v36  ;;  %v5135_v34 = vld [vmem:[%s6830_s9 + $0x1b8] sm:$0xff]  }
 0x9e4   : > { %v2697_v62 = vmul.f32 0.044715, %v2665_v40  ;;  %v2699_v63 = vmul.f32 0.044715, %v2667_v41  ;;  %v2681_v17 = vmul.f32 %v2649_v46, %v6438_v26  ;;  %v2652_v11 = vmul.f32 %v6451_v37, %v6451_v37 }
 0x9e5   : > { %4815 = vmatpush3.bf16.msra.mxu0 %v5127_v42  ;;  %v2698_v15 = vmul.f32 0.044715, %v2666_v54  ;;  %v2700_v16 = vmul.f32 0.044715, %v2668_v13  ;;  %v2683_v19 = vmul.f32 %v2651_v59, %v6440_v27  ;;  %v2682_v33 = vmul.f32 %v2650_v61, %v6449_v36  ;;  %v5138_v54 = vld [vmem:[%s6830_s9 + $0x200] sm:$0xff]  }
 0x9e6   : > { %4816 = vmatprep.subr.bf16.mxu0 %v5129_v38  ;;  %4795 = vmatpush3.bf16.msra.mxu1 %v5130_v39  ;;  %v2729_v35 = vadd.f32 %v2697_v62, %v6418_v8  ;;  %v2731_v43 = vadd.f32 %v2699_v63, %v6420_v18  ;;  %v2713_v20 = vmul.f32 0.044715, %v2681_v17  ;;  %v2684_v52 = vmul.f32 %v2652_v11, %v6451_v37 }
 0x9e7   : > { %4796 = vmatprep.subr.bf16.mxu1 %v5132_v53  ;;  %v2730_v44 = vadd.f32 %v2698_v15, %v6425_v51  ;;  %v2732_v55 = vadd.f32 %v2700_v16, %v6427_v56  ;;  %v2715_v60 = vmul.f32 0.044715, %v2683_v19  ;;  %v2714_v21 = vmul.f32 0.044715, %v2682_v33  ;;  %v5137_v53 = vld [vmem:[%s6830_s9 + $0x2c0] sm:$0xff]   ;;  %v5147_v15 = vld [vmem:[%s6830_s9 + $0x290] sm:$0xff]  }
 0x9e8   : > { %v2761_v25 = vmul.f32 0.7978846, %v2729_v35  ;;  %v2763_v7 = vmul.f32 0.7978846, %v2731_v43  ;;  %v2745_v29 = vadd.f32 %v2713_v20, %v6438_v26  ;;  %v2716_v32 = vmul.f32 0.044715, %v2684_v52 }
 0x9e9   : > { %4817 = vmatpush3.bf16.msra.mxu0 %v5131_v45  ;;  %v2762_v42 = vmul.f32 0.7978846, %v2730_v44  ;;  %v2764_v58 = vmul.f32 0.7978846, %v2732_v55  ;;  %v2747_v38 = vadd.f32 %v2715_v60, %v6440_v27  ;;  %v2746_v39 = vadd.f32 %v2714_v21, %v6449_v36  ;;  %v5149_v33 = vld [vmem:[%s6830_s9 + $0x2d8] sm:$0xff]  }
 0x9ea   : > { %5268 = vtanh.f32 %v2761_v25  ;;  %4818 = vmatprep.subr.bf16.mxu0 %v5133_v49  ;;  %4797 = vmatpush3.bf16.msra.mxu1 %v5134_v4  ;;  %v2777_v40 = vmul.f32 0.7978846, %v2745_v29  ;;  %v2748_v41 = vadd.f32 %v2716_v32, %v6451_v37  ;;  %v2918_v46 = vpack.c.bf16 %v6430_v23, %v6405_v57  ;;  %v5140_v57 = vld [vmem:[%s6830_s9 + $0x248] sm:$0xff]   ;;  %v5150_v35 = vld [vmem:[%s6830_s9 + $0x218] sm:$0xff]   ;;  %v5152_v49 = vld [vmem:[%s6830_s9 + $0x260] sm:$0xff]  }
 0x9eb   : > { %5270 = vtanh.f32 %v2763_v7  ;;  %v2779_v13 = vmul.f32 0.7978846, %v2747_v38  ;;  %v2888_v59 = vmul.f32 %v6407_v2, %v6273_v48  ;;  %v2904_v61 = vmul.f32 %v2872_v50, %v6292_v3  ;;  %4826 = vmatprep.subr.bf16.mxu1 %v5136_v22  ;;  %v5139_v48 = vld [vmem:[%s6830_s9 + $0x280] sm:$0xff]   ;;  %v5141_v3 = vld [vmem:[%s6830_s9 + $0x2c8] sm:$0xff]   ;;  %v5145_v2 = vld [vmem:[%s6830_s9 + $0x2d0] sm:$0xff]  }
 0x9ec   : > { %5272 = vtanh.f32 %v2762_v42  ;;  %v2778_v23 = vmul.f32 0.7978846, %v2746_v39  ;;  %4074 = vmatprep.mubr.bf16.mxu1 %v2918_v46  ;;  %v2919_v62 = vpack.c.bf16 %v6410_v0, %v6396_v47  ;;  %v2780_v63 = vmul.f32 0.7978846, %v2748_v41  ;;  %v5142_v47 = vld [vmem:[%s6830_s9 + $0x208] sm:$0xff]   ;;  %v5146_v0 = vld [vmem:[%s6830_s9 + $0x210] sm:$0xff]  }
 0x9ed   : > { %5274 = vtanh.f32 %v2764_v58  ;;  %4819 = vmatpush3.bf16.msra.mxu0 %v5135_v34  ;;  %v2920_v17 = vpack.c.bf16 %v2904_v61, %v2888_v59  ;;  %4075 = vmatmul.mubr.bf16.vlgmr.msra.gmra.mrb[48].mxu1 %v2917_v24  ;;  %v5148_v24 = vld [vmem:[%s6830_s9 + $0x258] sm:$0xff]   ;;  %v5153_v32 = vld [vmem:[%s6830_s9 + $0x2e0] sm:$0xff]   ;;  %v1612_v58 = vrot.slane %v6369_v28, %v1579_v9  ;;  %v1620_v34 = vrot.slane %v6369_v28, %v1587_v10 }
 0x9ee   : > { %5276 = vtanh.f32 %v2777_v40  ;;  %4848 = vmatprep.subr.bf16.mxu0 %v5137_v53  ;;  %4827 = vmatpush3.bf16.msra.mxu1 %v5138_v54  ;;  %v5151_v21 = vld [vmem:[%s6830_s9 + $0x298] sm:$0xff]   ;;  %v5154_v42 = vld [vmem:[%s6830_s9 + $0x220] sm:$0xff]   ;;  %v5156_v40 = vld [vmem:[%s6830_s9 + $0x268] sm:$0xff]   ;;  %v1616_v41 = vrot.slane %v6369_v28, %v1583_v12  ;;  %v1624_v46 = vrot.slane %v6369_v28, %v1591_v14 }
 0x9ef   : > { %5278 = vtanh.f32 %v2779_v13  ;;  %4115 = vmatprep.mubr.bf16.mxu0 %v2920_v17  ;;  %4828 = vmatprep.subr.bf16.mxu1 %v5140_v57  ;;  %v5155_v12 = vld [vmem:[%s6830_s9 + $0x2a0] sm:$0xff]  }
 0x9f0   : > { %5280 = vtanh.f32 %v2778_v23  ;;  %4116 = vmatmul.mubr.bf16.vlgmr.msra.gmra.mrb[36].mxu0 %v2919_v62 }
 0x9f1   : > { %5282 = vtanh.f32 %v2780_v63  ;;  %4849 = vmatpush3.bf16.msra.mxu0 %v5139_v48 }
 0x9f2   : > { %4850 = vmatprep.subr.bf16.mxu0 %v5141_v3  ;;  %4829 = vmatpush3.bf16.msra.mxu1 %v5142_v47 }
 0x9f3   : > { %4830 = vmatprep.subr.bf16.mxu1 %v5144_v31 }
 0x9f4   : > { %v5269_v50 = vpop.eup %5268 }
 0x9f5   : > { %v5271_v11 = vpop.eup %5270  ;;  %v2825_v45 = vadd.f32 1.0, %v5269_v50  ;;  %4851 = vmatpush3.bf16.msra.mxu0 %v5143_v1 }
 0x9f6   : > { %v5273_v16 = vpop.eup %5272  ;;  %v2827_v19 = vadd.f32 1.0, %v5271_v11  ;;  %4852 = vmatprep.subr.bf16.mxu0 %v5145_v2  ;;  %4831 = vmatpush3.bf16.msra.mxu1 %v5146_v0 }
 0x9f7   : > { %v5275_v43 = vpop.eup %5274  ;;  %4832 = vmatprep.subr.bf16.mxu1 %v5148_v24  ;;  %v2826_v4 = vadd.f32 1.0, %v5273_v16  ;;  %v2857_v52 = vmul.f32 0.5, %v2825_v45 }
 0x9f8   : > { %v5277_v20 = vpop.eup %5276  ;;  %v2859_v44 = vmul.f32 0.5, %v2827_v19  ;;  %v2828_v25 = vadd.f32 1.0, %v5275_v43  ;;  %v5162_v43 = vld [vmem:[%s6830_s9 + $0x230] sm:$0xff]  }
 0x9f9   : > { %v5279_v55 = vpop.eup %5278  ;;  %v2841_v60 = vadd.f32 1.0, %v5277_v20  ;;  %4853 = vmatpush3.bf16.msra.mxu0 %v5147_v15  ;;  %v2858_v22 = vmul.f32 0.5, %v2826_v4  ;;  %v6581_v53 = vmul.f32 %v2857_v52, %v6418_v8 }
 0x9fa   : > { %v5281_v7 = vpop.eup %5280  ;;  %v2843_v29 = vadd.f32 1.0, %v5279_v55  ;;  %4854 = vmatprep.subr.bf16.mxu0 %v5149_v33  ;;  %4833 = vmatpush3.bf16.msra.mxu1 %v5150_v35  ;;  %v6584_v10 = vmul.f32 %v2859_v44, %v6420_v18  ;;  %v6595_v28 = vmul.f32 0.5, %v2828_v25  ;;  %v5157_v18 = vld [vmem:[%s6830_s9 + $0x2e8] sm:$0xff]   ;;  %v5161_v35 = vld [vmem:[%s6830_s9 + $0x2f0] sm:$0xff]   ;;  %v5164_v44 = vld [vmem:[%s6830_s9 + $0x278] sm:$0xff]  }
 0x9fb   : > { %v5283_v38 = vpop.eup %5282  ;;  %v2873_v39 = vmul.f32 0.5, %v2841_v60  ;;  %4834 = vmatprep.subr.bf16.mxu1 %v5152_v49  ;;  %v2842_v9 = vadd.f32 1.0, %v5281_v7  ;;  %v6593_v14 = vmul.f32 %v2858_v22, %v6425_v51 }
 0x9fc   : > { %v2875_v54 = vmul.f32 0.5, %v2843_v29  ;;  %v2844_v63 = vadd.f32 1.0, %v5283_v38 }
 0x9fd   : > { %v6587_v13 = vmul.f32 %v2873_v39, %v6438_v26  ;;  %4855 = vmatpush3.bf16.msra.mxu0 %v5151_v21  ;;  %v2573_v59 = vpop.f32.mrb[40].mxu1  ;;  %v2616_v30 = vpop.f32.mrb[28].mxu0  ;;  %v2874_v61 = vmul.f32 0.5, %v2842_v9  ;;  %v5158_v26 = vld [vmem:[%s6830_s9 + $0x228] sm:$0xff]   ;;  %v5166_v9 = vld [vmem:[%s6830_s9 + $0x238] sm:$0xff]  }
 0x9fe   : > { %v6598_v8 = vmul.f32 %v2875_v54, %v6440_v27  ;;  %4856 = vmatprep.subr.bf16.mxu0 %v5153_v32  ;;  %4835 = vmatpush3.bf16.msra.mxu1 %v5154_v42  ;;  %v6606_v57 = vadd.f32 %v2573_v59, %v1612_v58  ;;  %v6608_v23 = vadd.f32 %v2616_v30, %v1620_v34  ;;  %v2575_v51 = vpop.f32.mrb[41].mxu1  ;;  %v2618_v62 = vpop.f32.mrb[29].mxu0  ;;  %v5160_v27 = vld [vmem:[%s6830_s9 + $0x270] sm:$0xff]   ;;  %v2876_v52 = vmul.f32 0.5, %v2844_v63 }
 0x9ff   : > { %4836 = vmatprep.subr.bf16.mxu1 %v5156_v40  ;;  %v6613_v17 = vadd.f32 %v2575_v51, %v1616_v41  ;;  %v6615_v48 = vadd.f32 %v2618_v62, %v1624_v46  ;;  %v2577_v3 = vpop.f32.mrb[42].mxu1  ;;  %v2620_v47 = vpop.f32.mrb[30].mxu0  ;;  %v6618_v31 = vmul.f32 %v2874_v61, %v6449_v36  ;;  %v2921_v1 = vpack.c.bf16 %v6587_v13, %v6581_v53  ;;  %v5159_v36 = vld [vmem:[%s6830_s9 + $0x2a8] sm:$0xff]   ;;  %v5163_v42 = vld [vmem:[%s6830_s9 + $0x2b0] sm:$0xff]  }
 0xa00   : > { %v2637_v2 = vmul.f32 %v6606_v57, %v6606_v57  ;;  %v2639_v0 = vmul.f32 %v6608_v23, %v6608_v23  ;;  %v6626_v24 = vadd.f32 %v2577_v3, %v1612_v58  ;;  %v6628_v50 = vadd.f32 %v2620_v47, %v1620_v34  ;;  %v2579_v11 = vpop.f32.mrb[43].mxu1  ;;  %v2622_v45 = vpop.f32.mrb[31].mxu0  ;;  %v5176_v53 = vld [vmem:[%s6830_s9 + $0x350] sm:$0xff]   ;;  %v5175_v13 = vld [vmem:[%s6830_s9 + $0x388] sm:$0xff]  }
 0xa01   : > { %4857 = vmatpush3.bf16.msra.mxu0 %v5155_v12  ;;  %v2638_v15 = vmul.f32 %v6613_v17, %v6613_v17  ;;  %v2640_v16 = vmul.f32 %v6615_v48, %v6615_v48  ;;  %v6637_v19 = vadd.f32 %v2579_v11, %v1616_v41  ;;  %v6639_v33 = vadd.f32 %v2622_v45, %v1624_v46  ;;  %v5165_v46 = vld [vmem:[%s6830_s9 + $0x2f8] sm:$0xff]  }
 0xa02   : > { %4858 = vmatprep.subr.bf16.mxu0 %v5157_v18  ;;  %4837 = vmatpush3.bf16.msra.mxu1 %v5158_v26  ;;  %v2669_v49 = vmul.f32 %v2637_v2, %v6606_v57  ;;  %v2671_v4 = vmul.f32 %v2639_v0, %v6608_v23  ;;  %v2653_v20 = vmul.f32 %v6626_v24, %v6626_v24  ;;  %v5168_v26 = vld [vmem:[%s6830_s9 + $0x340] sm:$0xff]   ;;  %v5167_v2 = vld [vmem:[%s6830_s9 + $0x2b8] sm:$0xff]  }
 0xa03   : > { %4838 = vmatprep.subr.bf16.mxu1 %v5160_v27  ;;  %v2670_v55 = vmul.f32 %v2638_v15, %v6613_v17  ;;  %v2672_v60 = vmul.f32 %v2640_v16, %v6615_v48  ;;  %v2655_v21 = vmul.f32 %v6628_v50, %v6628_v50  ;;  %v2654_v22 = vmul.f32 %v6637_v19, %v6637_v19  ;;  %v5169_v16 = vld [vmem:[%s6830_s9 + $0x3c0] sm:$0xff]  }
 0xa04   : > { %v2701_v25 = vmul.f32 0.044715, %v2669_v49  ;;  %v2703_v7 = vmul.f32 0.044715, %v2671_v4  ;;  %v2685_v29 = vmul.f32 %v2653_v20, %v6626_v24  ;;  %v2656_v32 = vmul.f32 %v6639_v33, %v6639_v33 }
 0xa05   : > { %4859 = vmatpush3.bf16.msra.mxu0 %v5159_v36  ;;  %v2702_v58 = vmul.f32 0.044715, %v2670_v55  ;;  %v2704_v34 = vmul.f32 0.044715, %v2672_v60  ;;  %v2687_v38 = vmul.f32 %v2655_v21, %v6628_v50  ;;  %v2686_v39 = vmul.f32 %v2654_v22, %v6637_v19  ;;  %v5179_v22 = vld [vmem:[%s6830_s9 + $0x390] sm:$0xff]  }
 0xa06   : > { %4860 = vmatprep.subr.bf16.mxu0 %v5161_v35  ;;  %4839 = vmatpush3.bf16.msra.mxu1 %v5162_v43  ;;  %v2733_v40 = vadd.f32 %v2701_v25, %v6606_v57  ;;  %v2735_v41 = vadd.f32 %v2703_v7, %v6608_v23  ;;  %v2717_v54 = vmul.f32 0.044715, %v2685_v29  ;;  %v2688_v12 = vmul.f32 %v2656_v32, %v6639_v33  ;;  %v5170_v35 = vld [vmem:[%s6830_s9 + $0x300] sm:$0xff]   ;;  %v5181_v29 = vld [vmem:[%s6830_s9 + $0x3d8] sm:$0xff]  }
 0xa07   : > { %4840 = vmatprep.subr.bf16.mxu1 %v5164_v44  ;;  %v2734_v59 = vadd.f32 %v2702_v58, %v6613_v17  ;;  %v2736_v30 = vadd.f32 %v2704_v34, %v6615_v48  ;;  %v2719_v61 = vmul.f32 0.044715, %v2687_v38  ;;  %v2718_v18 = vmul.f32 0.044715, %v2686_v39  ;;  %v5182_v32 = vld [vmem:[%s6830_s9 + $0x318] sm:$0xff]   ;;  %v5184_v58 = vld [vmem:[%s6830_s9 + $0x360] sm:$0xff]  }
 0xa08   : > { %v2765_v51 = vmul.f32 0.7978846, %v2733_v40  ;;  %v2767_v62 = vmul.f32 0.7978846, %v2735_v41  ;;  %v2749_v63 = vadd.f32 %v2717_v54, %v6626_v24  ;;  %v2720_v27 = vmul.f32 0.044715, %v2688_v12 }
 0xa09   : > { %4861 = vmatpush3.bf16.msra.mxu0 %v5163_v42  ;;  %v2766_v3 = vmul.f32 0.7978846, %v2734_v59  ;;  %v2768_v47 = vmul.f32 0.7978846, %v2736_v30  ;;  %v2751_v0 = vadd.f32 %v2719_v61, %v6628_v50  ;;  %v2750_v11 = vadd.f32 %v2718_v18, %v6637_v19  ;;  %v5185_v30 = vld [vmem:[%s6830_s9 + $0x3e0] sm:$0xff]  }
 0xa0a   : > { %5284 = vtanh.f32 %v2765_v51  ;;  %4862 = vmatprep.subr.bf16.mxu0 %v5165_v46  ;;  %4841 = vmatpush3.bf16.msra.mxu1 %v5166_v9  ;;  %v2781_v45 = vmul.f32 0.7978846, %v2749_v63  ;;  %v2752_v36 = vadd.f32 %v2720_v27, %v6639_v33  ;;  %v2922_v15 = vpack.c.bf16 %v6618_v31, %v6593_v14  ;;  %v5172_v14 = vld [vmem:[%s6830_s9 + $0x348] sm:$0xff]   ;;  %v5183_v9 = vld [vmem:[%s6830_s9 + $0x398] sm:$0xff]   ;;  %v5186_v61 = vld [vmem:[%s6830_s9 + $0x320] sm:$0xff]  }
 0xa0b   : > { %5286 = vtanh.f32 %v2767_v62  ;;  %v2783_v43 = vmul.f32 0.7978846, %v2751_v0  ;;  %v2892_v49 = vmul.f32 %v6595_v28, %v6427_v56  ;;  %v2908_v4 = vmul.f32 %v2876_v52, %v6451_v37  ;;  %4870 = vmatprep.subr.bf16.mxu1 %v5168_v26  ;;  %v5171_v56 = vld [vmem:[%s6830_s9 + $0x380] sm:$0xff]   ;;  %v5173_v37 = vld [vmem:[%s6830_s9 + $0x3c8] sm:$0xff]   ;;  %v5177_v28 = vld [vmem:[%s6830_s9 + $0x3d0] sm:$0xff]  }
 0xa0c   : > { %5288 = vtanh.f32 %v2766_v3  ;;  %v2782_v31 = vmul.f32 0.7978846, %v2750_v11  ;;  %4156 = vmatprep.mubr.bf16.mxu1 %v2922_v15  ;;  %v2923_v20 = vpack.c.bf16 %v6598_v8, %v6584_v10  ;;  %v2784_v44 = vmul.f32 0.7978846, %v2752_v36  ;;  %v5174_v10 = vld [vmem:[%s6830_s9 + $0x308] sm:$0xff]   ;;  %v5178_v8 = vld [vmem:[%s6830_s9 + $0x310] sm:$0xff]  }
 0xa0d   : > { %5290 = vtanh.f32 %v2768_v47  ;;  %4863 = vmatpush3.bf16.msra.mxu0 %v5167_v2  ;;  %v2924_v55 = vpack.c.bf16 %v2908_v4, %v2892_v49  ;;  %4157 = vmatmul.mubr.bf16.vlgmr.msra.gmra.mrb[52].mxu1 %v2921_v1  ;;  %v5180_v1 = vld [vmem:[%s6830_s9 + $0x358] sm:$0xff]   ;;  %v5188_v51 = vld [vmem:[%s6830_s9 + $0x368] sm:$0xff]   ;;  %v5187_v11 = vld [vmem:[%s6830_s9 + $0x3a0] sm:$0xff]  }
 0xa0e   : > { %5292 = vtanh.f32 %v2781_v45  ;;  %4892 = vmatprep.subr.bf16.mxu0 %v5169_v16  ;;  %4871 = vmatpush3.bf16.msra.mxu1 %v5170_v35  ;;  %v5189_v16 = vld [vmem:[%s6830_s9 + $0x3e8] sm:$0xff]   ;;  %v5192_v35 = vld [vmem:[%s6830_s9 + $0x370] sm:$0xff]  }
 0xa0f   : > { %5294 = vtanh.f32 %v2783_v43  ;;  %4197 = vmatprep.mubr.bf16.mxu0 %v2924_v55  ;;  %4872 = vmatprep.subr.bf16.mxu1 %v5172_v14  ;;  %v5197_v55 = vld [vmem:[%s6830_s9 + $0x3f8] sm:$0xff]  }
 0xa10   : > { %5296 = vtanh.f32 %v2782_v31  ;;  %4198 = vmatmul.mubr.bf16.vlgmr.msra.gmra.mrb[40].mxu0 %v2923_v20  ;;  %v5191_v31 = vld [vmem:[%s6830_s9 + $0x3a8] sm:$0xff]  }
 0xa11   : > { %5298 = vtanh.f32 %v2784_v44  ;;  %4893 = vmatpush3.bf16.msra.mxu0 %v5171_v56  ;;  %v5195_v44 = vld [vmem:[%s6830_s9 + $0x3b0] sm:$0xff]   ;;  %v5198_v56 = vld [vmem:[%s6830_s9 + $0x338] sm:$0xff]  }
 0xa12   : > { %4894 = vmatprep.subr.bf16.mxu0 %v5173_v37  ;;  %4873 = vmatpush3.bf16.msra.mxu1 %v5174_v10  ;;  %v5199_v37 = vld [vmem:[%s6830_s9 + $0x3b8] sm:$0xff]  }
 0xa13   : > { %4874 = vmatprep.subr.bf16.mxu1 %v5176_v53  ;;  %v4569_v53 = vld [vmem:[%s6831_s10] ss:$0 sm:$0xff] }
 0xa14   : > { %v5285_v52 = vpop.eup %5284 }
 0xa15   : > { %v5287_v60 = vpop.eup %5286  ;;  %v2829_v21 = vadd.f32 1.0, %v5285_v52  ;;  %4895 = vmatpush3.bf16.msra.mxu0 %v5175_v13 }
 0xa16   : > { %v5289_v25 = vpop.eup %5288  ;;  %v2831_v7 = vadd.f32 1.0, %v5287_v60  ;;  %4896 = vmatprep.subr.bf16.mxu0 %v5177_v28  ;;  %4875 = vmatpush3.bf16.msra.mxu1 %v5178_v8 }
 0xa17   : > { %v5291_v42 = vpop.eup %5290  ;;  %4876 = vmatprep.subr.bf16.mxu1 %v5180_v1  ;;  %v2830_v34 = vadd.f32 1.0, %v5289_v25  ;;  %v2861_v41 = vmul.f32 0.5, %v2829_v21 }
 0xa18   : > { %v5293_v38 = vpop.eup %5292  ;;  %v2832_v39 = vadd.f32 1.0, %v5291_v42  ;;  %v2863_v12 = vmul.f32 0.5, %v2831_v7 }
 0xa19   : > { %v5295_v40 = vpop.eup %5294  ;;  %v2845_v46 = vadd.f32 1.0, %v5293_v38  ;;  %4897 = vmatpush3.bf16.msra.mxu0 %v5179_v22  ;;  %v2862_v63 = vmul.f32 0.5, %v2830_v34  ;;  %v2893_v2 = vmul.f32 %v2861_v41, %v6606_v57  ;;  %v5190_v57 = vld [vmem:[%s6830_s9 + $0x328] sm:$0xff]  }
 0xa1a   : > { %v5297_v54 = vpop.eup %5296  ;;  %v2847_v59 = vadd.f32 1.0, %v5295_v40  ;;  %4898 = vmatprep.subr.bf16.mxu0 %v5181_v29  ;;  %4877 = vmatpush3.bf16.msra.mxu1 %v5182_v32  ;;  %v2864_v47 = vmul.f32 0.5, %v2832_v39  ;;  %v2895_v36 = vmul.f32 %v2863_v12, %v6608_v23 }
 0xa1b   : > { %v5299_v18 = vpop.eup %5298  ;;  %v2877_v26 = vmul.f32 0.5, %v2845_v46  ;;  %4878 = vmatprep.subr.bf16.mxu1 %v5184_v58  ;;  %v2846_v62 = vadd.f32 1.0, %v5297_v54  ;;  %v2894_v23 = vmul.f32 %v2862_v63, %v6613_v17  ;;  %v5193_v17 = vld [vmem:[%s6830_s9 + $0x3f0] sm:$0xff]  }
 0xa1c   : > { %v2879_v27 = vmul.f32 0.5, %v2847_v59  ;;  %v2848_v3 = vadd.f32 1.0, %v5299_v18  ;;  %v2896_v49 = vmul.f32 %v2864_v47, %v6615_v48 }
 0xa1d   : > { %v2909_v0 = vmul.f32 %v2877_v26, %v6626_v24  ;;  %4899 = vmatpush3.bf16.msra.mxu0 %v5183_v9  ;;  %v2878_v45 = vmul.f32 0.5, %v2846_v62 }
 0xa1e   : > { %v2911_v15 = vmul.f32 %v2879_v27, %v6628_v50  ;;  %4900 = vmatprep.subr.bf16.mxu0 %v5185_v30  ;;  %4879 = vmatpush3.bf16.msra.mxu1 %v5186_v61  ;;  %v2880_v24 = vmul.f32 0.5, %v2848_v3 }
 0xa1f   : > { %4880 = vmatprep.subr.bf16.mxu1 %v5188_v51  ;;  %v2910_v50 = vmul.f32 %v2878_v45, %v6637_v19  ;;  %v2925_v43 = vpack.c.bf16 %v2909_v0, %v2893_v2  ;;  %v5194_v19 = vld [vmem:[%s6830_s9 + $0x330] sm:$0xff]  }
 0xa20   : > { %v2912_v4 = vmul.f32 %v2880_v24, %v6639_v33  ;;  %v2927_v14 = vpack.c.bf16 %v2911_v15, %v2895_v36  ;;  %v5196_v33 = vld [vmem:[%s6830_s9 + $0x378] sm:$0xff]  }
 0xa21   : > { %4901 = vmatpush3.bf16.msra.mxu0 %v5187_v11  ;;  %v2926_v20 = vpack.c.bf16 %v2910_v50, %v2894_v23 }
 0xa22   : > { %4902 = vmatprep.subr.bf16.mxu0 %v5189_v16  ;;  %4881 = vmatpush3.bf16.msra.mxu1 %v5190_v57  ;;  %v2928_v48 = vpack.c.bf16 %v2912_v4, %v2896_v49 }
 0xa23   : > { %4882 = vmatprep.subr.bf16.mxu1 %v5192_v35  ;;  %4238 = vmatprep.mubr.bf16.mxu1 %v2926_v20 }
 0xa24   : > { %4279 = vmatprep.mubr.bf16.mxu0 %v2928_v48 }
 0xa25   : > { %4903 = vmatpush3.bf16.msra.mxu0 %v5191_v31 }
 0xa26   : > { %4904 = vmatprep.subr.bf16.mxu0 %v5193_v17  ;;  %4883 = vmatpush3.bf16.msra.mxu1 %v5194_v19 }
 0xa27   : > { %4884 = vmatprep.subr.bf16.mxu1 %v5196_v33 }
 0xa29   : > { %4905 = vmatpush3.bf16.msra.mxu0 %v5195_v44 }
 0xa2a   : > { %4906 = vmatprep.subr.bf16.mxu0 %v5197_v55  ;;  %4885 = vmatpush3.bf16.msra.mxu1 %v5198_v56 }
 0xa2d   : > { %4907 = vmatpush3.bf16.msra.mxu0 %v5199_v37  ;;  %4239 = vmatmul.mubr.bf16.vlgmr.msra.gmra.mrb[56].mxu1 %v2925_v43 }
 0xa30   : > { %4280 = vmatmul.mubr.bf16.vlgmr.msra.gmra.mrb[44].mxu0 %v2927_v14 }
 0xaa0   : > { %v4754_v10 = vpop.f32.mrb[44].mxu1 }
 0xaa1   : > { %v4755_v13 = vpop.f32.mrb[45].mxu1 }
 0xaa2   : > { %v4756_v28 = vadd.f32 %v4755_v13, %v4754_v10  ;;  %v4757_v8 = vpop.f32.mrb[46].mxu1 }
 0xaa3   : > { %v4776_v1 = vpop.f32.mrb[32].mxu0  ;;  %v4758_v52 = vpop.f32.mrb[47].mxu1 }
 0xaa4   : > { %v3995_v60 = vadd.f32 %v4756_v28, %v4569_v53  ;;  %v4777_v21 = vpop.f32.mrb[33].mxu0  ;;  %v4759_v22 = vadd.f32 %v4758_v52, %v4757_v8 }
 0xaa5   : > { %v4778_v25 = vadd.f32 %v4777_v21, %v4776_v1  ;;  %v4779_v7 = vpop.f32.mrb[34].mxu0 }
 0xaa6   : > { %v3998_v29 = vadd.f32 %v4759_v22, %v4569_v53  ;;  %v4780_v32 = vpop.f32.mrb[35].mxu0 }
 0xaa7   : > { %v4036_v42 = vadd.f32 %v4778_v25, %v3995_v60  ;;  %v4781_v58 = vadd.f32 %v4780_v32, %v4779_v7 }
 0xaa9   : > { %v4039_v34 = vadd.f32 %v4781_v58, %v3998_v29 }
 0xac0   : > { %v4798_v38 = vpop.f32.mrb[48].mxu1 }
 0xac1   : > { %v4799_v39 = vpop.f32.mrb[49].mxu1 }
 0xac2   : > { %v4800_v40 = vadd.f32 %v4799_v39, %v4798_v38  ;;  %v4801_v41 = vpop.f32.mrb[50].mxu1 }
 0xac3   : > { %v4820_v46 = vpop.f32.mrb[36].mxu0  ;;  %v4802_v9 = vpop.f32.mrb[51].mxu1 }
 0xac4   : > { %v4077_v54 = vadd.f32 %v4800_v40, %v4036_v42  ;;  %v4821_v12 = vpop.f32.mrb[37].mxu0  ;;  %v4803_v59 = vadd.f32 %v4802_v9, %v4801_v41  ;;  %v4698_v41 = vld [vmem:[%s6832_s11] ss:$0 sm:$0xff] }
 0xac5   : > { %v4822_v30 = vadd.f32 %v4821_v12, %v4820_v46  ;;  %v4823_v61 = vpop.f32.mrb[38].mxu0  ;;  %v4699_v9 = vld [vmem:[%s6833_s12] ss:$0 sm:$0xff] }
 0xac6   : > { %v4080_v18 = vadd.f32 %v4803_v59, %v4039_v34  ;;  %v4824_v26 = vpop.f32.mrb[39].mxu0 }
 0xac7   : > { %v4118_v51 = vadd.f32 %v4822_v30, %v4077_v54  ;;  %v4825_v62 = vadd.f32 %v4824_v26, %v4823_v61 }
 0xac9   : > { %v4121_v63 = vadd.f32 %v4825_v62, %v4080_v18 }
 0xae0   : > { %v4842_v27 = vpop.f32.mrb[52].mxu1 }
 0xae1   : > { %v4843_v3 = vpop.f32.mrb[53].mxu1 }
 0xae2   : > { %v4844_v47 = vadd.f32 %v4843_v3, %v4842_v27  ;;  %v4845_v2 = vpop.f32.mrb[54].mxu1 }
 0xae3   : > { %v4864_v0 = vpop.f32.mrb[40].mxu0  ;;  %v4846_v11 = vpop.f32.mrb[55].mxu1 }
 0xae4   : > { %v4159_v45 = vadd.f32 %v4844_v47, %v4118_v51  ;;  %v4865_v36 = vpop.f32.mrb[41].mxu0  ;;  %v4847_v15 = vadd.f32 %v4846_v11, %v4845_v2 }
 0xae5   : > { %v4866_v16 = vadd.f32 %v4865_v36, %v4864_v0  ;;  %v4867_v57 = vpop.f32.mrb[42].mxu0 }
 0xae6   : > { %v4162_v24 = vadd.f32 %v4847_v15, %v4121_v63  ;;  %v4868_v35 = vpop.f32.mrb[43].mxu0 }
 0xae7   : > { %v4200_v23 = vadd.f32 %v4866_v16, %v4159_v45  ;;  %v4869_v50 = vadd.f32 %v4868_v35, %v4867_v57 }
 0xae9   : > { %v4203_v43 = vadd.f32 %v4869_v50, %v4162_v24 }
 0xb00   : > { %v4886_v49 = vpop.f32.mrb[56].mxu1 }
 0xb01   : > { %v4887_v4 = vpop.f32.mrb[57].mxu1 }
 0xb02   : > { %v4888_v14 = vadd.f32 %v4887_v4, %v4886_v49  ;;  %v4889_v31 = vpop.f32.mrb[58].mxu1 }
 0xb03   : > { %v4908_v20 = vpop.f32.mrb[44].mxu0  ;;  %v4890_v17 = vpop.f32.mrb[59].mxu1 }
 0xb04   : > { %v4241_v19 = vadd.f32 %v4888_v14, %v4200_v23  ;;  %v4909_v48 = vpop.f32.mrb[45].mxu0  ;;  %v4891_v33 = vadd.f32 %v4890_v17, %v4889_v31 }
 0xb05   : > { %v4910_v44 = vadd.f32 %v4909_v48, %v4908_v20  ;;  %v4911_v55 = vpop.f32.mrb[46].mxu0 }
 0xb06   : > { %v4244_v56 = vadd.f32 %v4891_v33, %v4203_v43  ;;  %v4912_v37 = vpop.f32.mrb[47].mxu0 }
 0xb07   : > { %v4282_v10 = vadd.f32 %v4910_v44, %v4241_v19  ;;  %v4913_v53 = vadd.f32 %v4912_v37, %v4911_v55 }
 0xb09   : > { %v4285_v13 = vadd.f32 %v4913_v53, %v4244_v56  ;;  %v4288_v28 = vadd.f32 %v4282_v10, %v5786_v5 }
 0xb0b   : > { %4292 = vadd.xlane.f32.xlu1 %v4288_v28  ;;  %v4289_v8 = vadd.f32 %v4285_v13, %v5788_v6 }
 0xb0d   : > { %v4294_v1 = vsel %vm1388_vm8, %v4289_v8, 0.0 }
 0xb0e   : > { %4295 = vadd.xlane.f32.xlu0 %v4294_v1 }
 0xb98   : > { %v4293_v52 = vpop.xlane.xlu1 %4292 }
 0xb99   : > { %v4297_v60 = vmul.f32 0.0078125, %v4293_v52 }
 0xb9b   : > { %v4299_v21 = vsub.f32 %v4288_v28, %v4297_v60  ;;  %v4296_v22 = vpop.xlane.xlu0 %4295 }
 0xb9c   : > { %v4298_v25 = vmul.f32 0.0078125, %v4296_v22 }
 0xb9d   : > { %v4301_v7 = vmul.f32 %v4299_v21, %v4299_v21 }
 0xb9e   : > { %v4300_v29 = vsub.f32 %v4289_v8, %v4298_v25 }
 0xb9f   : > { %4303 = vadd.xlane.f32.xlu0 %v4301_v7 }
 0xba0   : > { %v4302_v32 = vmul.f32 %v4300_v29, %v4300_v29 }
 0xba2   : > { %v4305_v42 = vsel %vm1388_vm8, %v4302_v32, 0.0 }
 0xba3   : > { %4306 = vadd.xlane.f32.xlu1 %v4305_v42 }
 0xc2c   : > { %v4304_v5 = vpop.xlane.xlu0 %4303 }
 0xc2d   : > { %v4308_v58 = vmul.f32 0.0078125, %v4304_v5 }
 0xc2f   : > { %v4310_v34 = vadd.f32 1e-05, %v4308_v58 }
 0xc30   : > { %v4307_v6 = vpop.xlane.xlu1 %4306 }
 0xc31   : > { %5300 = vrsqrt.f32 %v4310_v34  ;;  %v4309_v38 = vmul.f32 0.0078125, %v4307_v6 }
 0xc33   : > { %v4311_v39 = vadd.f32 1e-05, %v4309_v38 }
 0xc35   : > { %5302 = vrsqrt.f32 %v4311_v39 }
 0xc3b   : > { %v5301_v40 = vpop.eup %5300 }
 0xc3c   : > { %v4314_v46 = vmul.f32 %v5301_v40, %v4299_v21 }
 0xc3e   : > { %v4322_v54 = vmul.f32 %v4698_v41, %v4314_v46 }
 0xc3f   : > { %v5303_v12 = vpop.eup %5302 }
 0xc40   : > { %v4330_v59 = vadd.f32 %v4699_v9, %v4322_v54  ;;  %v4315_v30 = vmul.f32 %v5303_v12, %v4300_v29 }
 0xc42   : > { %4332 = vst [vmem:[%s440_s14] sm:$0xff] %v4330_v59  ;;  %v4323_v61 = vmul.f32 %v4698_v41, %v4315_v30 }
 0xc44   : > { %v4331_v18 = vadd.f32 %v4699_v9, %v4323_v61 }
 0xc46   : > { %4333 = vst [vmem:[%s440_s14 + $0x8] sm:$0x1] %v4331_v18 }
 0xc47 PF: > { %s23_s25 = sadd.s32 1, %s5312_s25  }
 0xc48   : > { %p20_p4 = scmp.ge.s32.totalorder %s23_s25, 4  }
 0xc4a   :  { %22 = sbr.rel (!%p20_p4) target bundleno = 1 (0x1), region = 102 }

</bundles_post_ra>
